<compile_context>
chip_gen: v6e
topology: v6e:2x2x1
jax: 0.10.0
libtpu: 0.0.40
codegen_flags: <defaults>
</compile_context>

<pallas_src>
import functools

import jax
import jax.numpy as jnp
from jax import lax
from jax.experimental import pallas as pl
from jax.experimental.pallas import tpu as pltpu

# TODO(synk): cfg.TRAIN_POSITIVES_PER_QUERY / cfg.TRAIN_NEGATIVES_PER_QUERY come from an
# external config; hard-coded to 1 (the original B>=3 branches effectively require 1).
TRAIN_POSITIVES_PER_QUERY = 1
TRAIN_NEGATIVES_PER_QUERY = 1


def _const_spec(shape):
    """BlockSpec for an array that is fully resident with a constant block index."""
    nd = len(shape)
    return pl.BlockSpec(shape, lambda *args, _nd=nd: (0,) * _nd)


# ---------------------------------------------------------------------------
# Stage 1: wide QKV (+ MLP-query-half) projection pre-pass over all blocks.
# ---------------------------------------------------------------------------
def _qkv_prepass_kernel(xw_ref, wq_ref, bq_ref, wk_ref, bk_ref, wv_ref, w1x_ref, b1_ref,
                        q_ref, k_ref, v_ref, x1_ref,
                        *, num_heads, head_dim, num_blocks, np_pad):
    f32 = jnp.float32
    xw = xw_ref[...]                                                     # (C, B*Np) bf16

    # Wide, lane-dense projections: every descriptor block projected exactly once.
    q = jnp.dot(wq_ref[...], xw, preferred_element_type=f32) + bq_ref[...]   # scale folded
    k = jnp.dot(wk_ref[...], xw, preferred_element_type=f32) + bk_ref[...]
    v = jnp.dot(wv_ref[...], xw, preferred_element_type=f32)                 # bv folded into bm
    x1 = jnp.dot(w1x_ref[...], xw, preferred_element_type=f32) + b1_ref[...]  # w1[:, :C]@x + b1

    # Store head-split (B, H, d, Np) bf16 so stage 2 needs no reshapes or concats.
    for b in range(num_blocks):
        cs = b * np_pad
        x1_ref[b] = x1[:, cs:cs + np_pad].astype(x1_ref.dtype)
        for h in range(num_heads):
            rs = h * head_dim
            q_ref[b, h] = q[rs:rs + head_dim, cs:cs + np_pad].astype(q_ref.dtype)
            k_ref[b, h] = k[rs:rs + head_dim, cs:cs + np_pad].astype(k_ref.dtype)
            v_ref[b, h] = v[rs:rs + head_dim, cs:cs + np_pad].astype(v_ref.dtype)


def _qkv_prepass(feats_wide, w, num_heads, num_blocks, np_pad):
    C, BNp = feats_wide.shape
    d = C // num_heads
    kernel = functools.partial(_qkv_prepass_kernel, num_heads=num_heads, head_dim=d,
                               num_blocks=num_blocks, np_pad=np_pad)
    qkv_shape = jax.ShapeDtypeStruct((num_blocks, num_heads, d, np_pad), jnp.bfloat16)
    x1_shape = jax.ShapeDtypeStruct((num_blocks, 2 * C, np_pad), jnp.bfloat16)
    return pl.pallas_call(
        kernel,
        grid=(1,),
        in_specs=[
            _const_spec((C, BNp)),
            _const_spec((C, C)), _const_spec((C, 1)),
            _const_spec((C, C)), _const_spec((C, 1)),
            _const_spec((C, C)),
            _const_spec((2 * C, C)), _const_spec((2 * C, 1)),
        ],
        out_specs=(
            _const_spec((num_blocks, num_heads, d, np_pad)),
            _const_spec((num_blocks, num_heads, d, np_pad)),
            _const_spec((num_blocks, num_heads, d, np_pad)),
            _const_spec((num_blocks, 2 * C, np_pad)),
        ),
        out_shape=(qkv_shape, qkv_shape, qkv_shape, x1_shape),
        compiler_params=pltpu.CompilerParams(
            dimension_semantics=("arbitrary",),
            vmem_limit_bytes=32 * 1024 * 1024),
    )(feats_wide, w["wq"], w["bq"], w["wk"], w["bk"], w["wv"], w["w1x"], w["b1"])


# ---------------------------------------------------------------------------
# Stage 2: one independent grid step per output block; fori_loop over its sources.
# ---------------------------------------------------------------------------
def _gcn_out_kernel(tbl_ref, q_ref, x1_ref, kall_ref, vall_ref,
                    wmh_ref, bm_ref, w1m_ref, w2_ref, b2_ref, o_ref,
                    *, n_valid):
    f32 = jnp.float32
    bf16 = jnp.bfloat16

    i = pl.program_id(0)
    nsrc = tbl_ref[i, 1]                       # number of sources accumulated into output i

    qh = q_ref[0]                              # (H, d, Np) bf16, scale folded into wq
    x1 = x1_ref[0].astype(f32)                 # (2C, Np)  w1[:, :C] @ x + b1 (from pre-pass)

    H, d, Np = qh.shape
    C = H * d

    col3 = lax.broadcasted_iota(jnp.int32, (1, 1, Np), 2)
    valid3 = col3 < n_valid                                            # padded kv columns
    valid_f = (lax.broadcasted_iota(jnp.int32, (1, Np), 1) < n_valid).astype(f32)
    inv_n = 1.0 / n_valid

    def one_source(s, acc):
        src = tbl_ref[i, 2 + s]
        kh = kall_ref[src]                                             # (H, d, Np) bf16
        vh = vall_ref[src]                                             # (H, d, Np) bf16

        # Batched all-head scores: bf16 operands, f32 accumulation.
        sc = jnp.einsum('hdn,hdm->hnm', qh, kh, preferred_element_type=f32)
        sc = jnp.where(valid3, sc, -1e30)                              # mask padded columns
        sc = sc - jnp.max(sc, axis=-1, keepdims=True)
        p = jnp.exp(sc)
        p = p * pl.reciprocal(jnp.sum(p, axis=-1, keepdims=True), approx=True)

        attn = jnp.einsum('hdm,hnm->hdn', vh, p.astype(bf16),
                          preferred_element_type=f32)                  # (H, d, Nq)

        # Merge conv as batched per-head matmuls + head sum (v bias folded into bm).
        msg = jnp.sum(jnp.einsum('hdc,hdn->hcn', wmh_ref[...], attn.astype(bf16),
                                 preferred_element_type=f32), axis=0) + bm_ref[...]

        # MLP layer 1: w1 @ cat([x, msg]) + b1 == (w1x@x + b1) + w1m@msg  (no concat).
        h1 = x1 + jnp.dot(w1m_ref[...], msg.astype(bf16), preferred_element_type=f32)

        # InstanceNorm1d (affine=False, biased variance, eps=1e-5) over valid columns + ReLU.
        mean = jnp.sum(h1 * valid_f, axis=-1, keepdims=True) * inv_n
        diff = h1 - mean
        var = jnp.sum(diff * diff * valid_f, axis=-1, keepdims=True) * inv_n
        h1n = jnp.maximum(diff * lax.rsqrt(var + 1e-5), 0.0)

        out = jnp.dot(w2_ref[...], h1n.astype(bf16), preferred_element_type=f32) + b2_ref[...]
        return acc + out

    acc = lax.fori_loop(0, nsrc, one_source, jnp.zeros((C, Np), f32))
    o_ref[0] = acc.astype(o_ref.dtype)


def _run_outputs(table, q_all, x1_all, k_all, v_all, w, num_out, n_valid):
    B, H, d, Np = q_all.shape
    C = H * d
    kernel = functools.partial(_gcn_out_kernel, n_valid=n_valid)

    grid_spec = pltpu.PrefetchScalarGridSpec(
        num_scalar_prefetch=1,
        grid=(num_out,),
        in_specs=[
            pl.BlockSpec((1, H, d, Np), lambda i, tbl: (tbl[i, 0], 0, 0, 0)),  # q of query block
            pl.BlockSpec((1, 2 * C, Np), lambda i, tbl: (tbl[i, 0], 0, 0)),    # w1x@x + b1
            _const_spec((B, H, d, Np)),                                        # K of all blocks
            _const_spec((B, H, d, Np)),                                        # V of all blocks
            _const_spec((H, d, C)),                                            # merge (head-major)
            _const_spec((C, 1)),                                               # bm + wm@bv
            _const_spec((2 * C, C)),                                           # w1[:, C:]
            _const_spec((C, 2 * C)), _const_spec((C, 1)),                      # w2, b2
        ],
        out_specs=pl.BlockSpec((1, C, Np), lambda i, tbl: (i, 0, 0)),
    )
    return pl.pallas_call(
        kernel,
        grid_spec=grid_spec,
        out_shape=jax.ShapeDtypeStruct((num_out, C, Np), jnp.bfloat16),
        compiler_params=pltpu.CompilerParams(
            dimension_semantics=("parallel",),     # independent steps -> v7x 2-TC sharding
            vmem_limit_bytes=32 * 1024 * 1024),
    )(table, q_all, x1_all, k_all, v_all,
      w["wm_h"], w["bm"], w["w1m"], w["w2"], w["b2"])


# ---------------------------------------------------------------------------
# Host-side schedule / weight preparation / wrapper.
# ---------------------------------------------------------------------------
def _build_schedule(B, p=TRAIN_POSITIVES_PER_QUERY, n=TRAIN_NEGATIVES_PER_QUERY):
    """Rows: [query_block, num_sources, src0, src1, src2]; one row per output block."""
    assert p == 1 and n == 1, "schedule assumes 1 positive / 1 negative per query"
    if B >= 4:
        rows = [[0, 3, 1, 2, 3], [1, 1, 0, 0, 0], [2, 1, 0, 0, 0], [3, 1, 0, 0, 0]]
    elif B == 3:
        rows = [[0, 2, 1, 2, 0], [1, 1, 0, 0, 0], [2, 1, 0, 0, 0]]
    elif B == 2:
        rows = [[0, 1, 1, 0, 0], [1, 1, 0, 0, 0]]
    else:
        rows = [[0, 1, 0, 0, 0]]
    return jnp.asarray(rows, dtype=jnp.int32), len(rows)


def _prepare_weights(params, num_heads):
    """Head-major permutation, scale/bias folding, w1 split, bf16 casts for MXU operands."""
    f32, bf16 = jnp.float32, jnp.bfloat16
    C = params["wq"].shape[0]
    d = C // num_heads
    scale = 1.0 / (d ** 0.5)
    # PyTorch .view(dim, num_heads): channel c = d_idx*H + h.  Head-major row = h*d + d_idx.
    perm = jnp.arange(C).reshape(d, num_heads).T.reshape(-1)

    wq = params["wq"][perm, :] * scale        # fold 1/sqrt(d) into the q projection
    bq = params["bq"][perm] * scale
    wk = params["wk"][perm, :]
    bk = params["bk"][perm]
    wv = params["wv"][perm, :]
    bv = params["bv"][perm]
    wm = params["wm"][:, perm]                # merge columns follow head-major layout
    bm = params["bm"] + wm @ bv               # fold v bias through the merge conv
    wm_h = wm.T.reshape(num_heads, d, C)      # (H, d, C): per-head merge weights
    w1x = params["w1"][:, :C]                 # acts on the query descriptors
    w1m = params["w1"][:, C:]                 # acts on the attention message

    return dict(
        wq=wq.astype(bf16), bq=bq.astype(f32)[:, None],
        wk=wk.astype(bf16), bk=bk.astype(f32)[:, None],
        wv=wv.astype(bf16),
        wm_h=wm_h.astype(bf16), bm=bm.astype(f32)[:, None],
        w1x=w1x.astype(bf16), w1m=w1m.astype(bf16), b1=params["b1"].astype(f32)[:, None],
        w2=params["w2"].astype(bf16), b2=params["b2"].astype(f32)[:, None],
    )


def cross_attention_all_weights(descs, params, num_heads):
    """descs: [B, N, C] -> output [num_out, N, C] (matches the PyTorch forward)."""
    B, N, C = descs.shape
    if B < 1:
        return descs
    assert C % num_heads == 0

    Np = max(128, ((N + 127) // 128) * 128)                     # lane-dense pad
    # Single host pass over the input: [B, N, C] -> (C, B*Np) bf16 (blocks side by side).
    feats = jnp.transpose(descs, (2, 0, 1))                     # (C, B, N)
    feats = jnp.pad(feats, ((0, 0), (0, 0), (0, Np - N)))       # (C, B, Np)
    feats_wide = feats.reshape(C, B * Np).astype(jnp.bfloat16)  # (C, B*Np)

    w = _prepare_weights(params, num_heads)
    q_all, k_all, v_all, x1_all = _qkv_prepass(feats_wide, w, num_heads, B, Np)

    table, num_out = _build_schedule(B)
    out = _run_outputs(table, q_all, x1_all, k_all, v_all, w, num_out, N)   # bf16
    return jnp.transpose(out[:, :, :N], (0, 2, 1)).astype(jnp.float32)


# ---------------------------------------------------------------------------
# Synthetic parameters + pure-JAX reference (mirrors the PyTorch module).
# ---------------------------------------------------------------------------
def init_params(key, num_heads, feature_dim):
    C = feature_dim
    assert C % num_heads == 0
    keys = jax.random.split(key, 12)

    def conv_init(kw, kb, c_out, c_in):
        bound = 1.0 / (c_in ** 0.5)
        wgt = jax.random.uniform(kw, (c_out, c_in), jnp.float32, -bound, bound)
        b = jax.random.uniform(kb, (c_out,), jnp.float32, -bound, bound)
        return wgt, b

    wq, bq = conv_init(keys[0], keys[1], C, C)            # MultiHeadedAttention.proj[0]
    wk, bk = conv_init(keys[2], keys[3], C, C)            # proj[1]
    wv, bv = conv_init(keys[4], keys[5], C, C)            # proj[2]
    wm, bm = conv_init(keys[6], keys[7], C, C)            # merge
    w1, b1 = conv_init(keys[8], keys[9], 2 * C, 2 * C)    # mlp conv1
    w2, b2 = conv_init(keys[10], keys[11], C, 2 * C)      # mlp conv2
    b2 = jnp.zeros_like(b2)                               # nn.init.constant_(mlp[-1].bias, 0)
    return dict(wq=wq, bq=bq, wk=wk, bk=bk, wv=wv, bv=bv,
                wm=wm, bm=bm, w1=w1, b1=b1, w2=w2, b2=b2)


def _attentional_propagation_ref(x, source, params, num_heads):
    """x, source: (C, N) float32 — straight transcription of the PyTorch module."""
    C, N = x.shape
    d = C // num_heads
    q = params["wq"] @ x + params["bq"][:, None]
    k = params["wk"] @ source + params["bk"][:, None]
    v = params["wv"] @ source + params["bv"][:, None]
    qh = q.reshape(d, num_heads, N)
    kh = k.reshape(d, num_heads, N)
    vh = v.reshape(d, num_heads, N)
    scores = jnp.einsum('dhn,dhm->hnm', qh, kh) / (d ** 0.5)
    prob = jax.nn.softmax(scores, axis=-1)
    attn = jnp.einsum('hnm,dhm->dhn', prob, vh).reshape(C, N)
    msg = params["wm"] @ attn + params["bm"][:, None]
    h = params["w1"] @ jnp.concatenate([x, msg], axis=0) + params["b1"][:, None]
    mean = jnp.mean(h, axis=-1, keepdims=True)
    var = jnp.mean((h - mean) ** 2, axis=-1, keepdims=True)
    h = jnp.maximum((h - mean) / jnp.sqrt(var + 1e-5), 0.0)
    return params["w2"] @ h + params["b2"][:, None]


def _reference_forward(descs, params, num_heads):
    feats = jnp.transpose(descs, (0, 2, 1)).astype(jnp.float32)   # (B, C, N)
    B = feats.shape[0]
    ap = lambda a, b: _attentional_propagation_ref(a, b, params, num_heads)
    if B >= 4:
        outs = [ap(feats[0], feats[1]) + ap(feats[0], feats[2]) + ap(feats[0], feats[3]),
                ap(feats[1], feats[0]), ap(feats[2], feats[0]), ap(feats[3], feats[0])]
    elif B == 3:
        outs = [ap(feats[0], feats[1]) + ap(feats[0], feats[2]),
                ap(feats[1], feats[0]), ap(feats[2], feats[0])]
    elif B == 2:
        outs = [ap(feats[0], feats[1]), ap(feats[1], feats[0])]
    else:
        outs = [ap(feats[0], feats[0])]
    return jnp.transpose(jnp.stack(outs, axis=0), (0, 2, 1))


if __name__ == "__main__":
    num_heads = 4
    feature_dim = 32
    B, N = 4, 16      # descs: [B, N, C]; B=4 exercises the 3-source accumulation schedule

    key = jax.random.PRNGKey(0)
    kp, kd = jax.random.split(key)
    params = init_params(kp, num_heads, feature_dim)
    descs = jax.random.normal(kd, (B, N, feature_dim), dtype=jnp.float32)

    out = cross_attention_all_weights(descs, params, num_heads)
    out = jax.block_until_ready(out)
    assert out.shape == (4, N, feature_dim), out.shape
    assert bool(jnp.all(jnp.isfinite(out)))

    # Loose tolerance: bf16 operands + approximate softmax reciprocal vs f32 reference.
    ref = _reference_forward(descs, params, num_heads)
    err = float(jnp.max(jnp.abs(out - ref)))
    assert err < 0.25, f"kernel/reference mismatch: max abs err {err}"

    print("KERNEL_OK")
</pallas_src>

<mosaic_0001>
module attributes {stable_mosaic.version = 11 : i64} {
  func.func @_qkv_prepass_kernel(%arg0: i32, %arg1: memref<32x512xbf16, #tpu.memory_space<vmem>>, %arg2: memref<32x32xbf16, #tpu.memory_space<vmem>>, %arg3: memref<32x1xf32, #tpu.memory_space<vmem>>, %arg4: memref<32x32xbf16, #tpu.memory_space<vmem>>, %arg5: memref<32x1xf32, #tpu.memory_space<vmem>>, %arg6: memref<32x32xbf16, #tpu.memory_space<vmem>>, %arg7: memref<64x32xbf16, #tpu.memory_space<vmem>>, %arg8: memref<64x1xf32, #tpu.memory_space<vmem>>, %arg9: memref<4x4x8x128xbf16, #tpu.memory_space<vmem>>, %arg10: memref<4x4x8x128xbf16, #tpu.memory_space<vmem>>, %arg11: memref<4x4x8x128xbf16, #tpu.memory_space<vmem>>, %arg12: memref<4x64x128xbf16, #tpu.memory_space<vmem>>) attributes {dimension_semantics = [#tpu.dimension_semantics<arbitrary>], iteration_bounds = array<i64: 1>, scalar_prefetch = 0 : i64, scratch_operands = 0 : i64, tpu.core_type = #tpu.core_type<tc>, window_params = [{pipeline_mode = #tpu.pipeline_mode<synchronous>, transform_indices = @transform_0, window_bounds = array<i64: 32, 512>}, {pipeline_mode = #tpu.pipeline_mode<synchronous>, transform_indices = @transform_1, window_bounds = array<i64: 32, 32>}, {pipeline_mode = #tpu.pipeline_mode<synchronous>, transform_indices = @transform_2, window_bounds = array<i64: 32, 1>}, {pipeline_mode = #tpu.pipeline_mode<synchronous>, transform_indices = @transform_3, window_bounds = array<i64: 32, 32>}, {pipeline_mode = #tpu.pipeline_mode<synchronous>, transform_indices = @transform_4, window_bounds = array<i64: 32, 1>}, {pipeline_mode = #tpu.pipeline_mode<synchronous>, transform_indices = @transform_5, window_bounds = array<i64: 32, 32>}, {pipeline_mode = #tpu.pipeline_mode<synchronous>, transform_indices = @transform_6, window_bounds = array<i64: 64, 32>}, {pipeline_mode = #tpu.pipeline_mode<synchronous>, transform_indices = @transform_7, window_bounds = array<i64: 64, 1>}, {pipeline_mode = #tpu.pipeline_mode<synchronous>, transform_indices = @transform_8, window_bounds = array<i64: 4, 4, 8, 128>}, {pipeline_mode = #tpu.pipeline_mode<synchronous>, transform_indices = @transform_9, window_bounds = array<i64: 4, 4, 8, 128>}, {pipeline_mode = #tpu.pipeline_mode<synchronous>, transform_indices = @transform_10, window_bounds = array<i64: 4, 4, 8, 128>}, {pipeline_mode = #tpu.pipeline_mode<synchronous>, transform_indices = @transform_11, window_bounds = array<i64: 4, 64, 128>}]} {
    %c0 = arith.constant 0 : index
    %c0_0 = arith.constant 0 : index
    %0 = vector.load %arg1[%c0, %c0_0] : memref<32x512xbf16, #tpu.memory_space<vmem>>, vector<32x512xbf16>
    %c0_1 = arith.constant 0 : index
    %c0_2 = arith.constant 0 : index
    %1 = vector.load %arg2[%c0_1, %c0_2] : memref<32x32xbf16, #tpu.memory_space<vmem>>, vector<32x32xbf16>
    %cst = arith.constant dense<0.000000e+00> : vector<32x512xf32>
    %2 = tpu.matmul %1, %0, %cst {dimension_numbers = #tpu.dot_dimension_numbers<[1], [0], [0], [1], [0, 0, 1, 1], [], []>} : vector<32x32xbf16>, vector<32x512xbf16>, vector<32x512xf32> -> vector<32x512xf32>
    %c0_3 = arith.constant 0 : index
    %c0_4 = arith.constant 0 : index
    %3 = vector.load %arg3[%c0_3, %c0_4] : memref<32x1xf32, #tpu.memory_space<vmem>>, vector<32x1xf32>
    %4 = vector.broadcast %3 : vector<32x1xf32> to vector<32x512xf32>
    %5 = arith.addf %2, %4 : vector<32x512xf32>
    %c0_5 = arith.constant 0 : index
    %c0_6 = arith.constant 0 : index
    %6 = vector.load %arg4[%c0_5, %c0_6] : memref<32x32xbf16, #tpu.memory_space<vmem>>, vector<32x32xbf16>
    %cst_7 = arith.constant dense<0.000000e+00> : vector<32x512xf32>
    %7 = tpu.matmul %6, %0, %cst_7 {dimension_numbers = #tpu.dot_dimension_numbers<[1], [0], [0], [1], [0, 0, 1, 1], [], []>} : vector<32x32xbf16>, vector<32x512xbf16>, vector<32x512xf32> -> vector<32x512xf32>
    %c0_8 = arith.constant 0 : index
    %c0_9 = arith.constant 0 : index
    %8 = vector.load %arg5[%c0_8, %c0_9] : memref<32x1xf32, #tpu.memory_space<vmem>>, vector<32x1xf32>
    %9 = vector.broadcast %8 : vector<32x1xf32> to vector<32x512xf32>
    %10 = arith.addf %7, %9 : vector<32x512xf32>
    %c0_10 = arith.constant 0 : index
    %c0_11 = arith.constant 0 : index
    %11 = vector.load %arg6[%c0_10, %c0_11] : memref<32x32xbf16, #tpu.memory_space<vmem>>, vector<32x32xbf16>
    %cst_12 = arith.constant dense<0.000000e+00> : vector<32x512xf32>
    %12 = tpu.matmul %11, %0, %cst_12 {dimension_numbers = #tpu.dot_dimension_numbers<[1], [0], [0], [1], [0, 0, 1, 1], [], []>} : vector<32x32xbf16>, vector<32x512xbf16>, vector<32x512xf32> -> vector<32x512xf32>
    %c0_13 = arith.constant 0 : index
    %c0_14 = arith.constant 0 : index
    %13 = vector.load %arg7[%c0_13, %c0_14] : memref<64x32xbf16, #tpu.memory_space<vmem>>, vector<64x32xbf16>
    %cst_15 = arith.constant dense<0.000000e+00> : vector<64x512xf32>
    %14 = tpu.matmul %13, %0, %cst_15 {dimension_numbers = #tpu.dot_dimension_numbers<[1], [0], [0], [1], [0, 0, 1, 1], [], []>} : vector<64x32xbf16>, vector<32x512xbf16>, vector<64x512xf32> -> vector<64x512xf32>
    %c0_16 = arith.constant 0 : index
    %c0_17 = arith.constant 0 : index
    %15 = vector.load %arg8[%c0_16, %c0_17] : memref<64x1xf32, #tpu.memory_space<vmem>>, vector<64x1xf32>
    %16 = vector.broadcast %15 : vector<64x1xf32> to vector<64x512xf32>
    %17 = arith.addf %14, %16 : vector<64x512xf32>
    %18 = vector.extract_strided_slice %17 {offsets = [0, 0], sizes = [64, 128], strides = [1, 1]} : vector<64x512xf32> to vector<64x128xf32>
    %19 = arith.truncf %18 : vector<64x128xf32> to vector<64x128xbf16>
    %c0_18 = arith.constant 0 : index
    %c0_19 = arith.constant 0 : index
    %c0_20 = arith.constant 0 : index
    %20 = vector.load %arg12[%c0_18, %c0_19, %c0_20] : memref<4x64x128xbf16, #tpu.memory_space<vmem>>, vector<1x64x128xbf16>
    %21 = vector.shape_cast %20 : vector<1x64x128xbf16> to vector<64x128xbf16>
    %22 = vector.shape_cast %19 : vector<64x128xbf16> to vector<1x64x128xbf16>
    tpu.vector_store %arg12[%c0_18, %c0_19, %c0_20], %22 {strides = array<i32>} : memref<4x64x128xbf16, #tpu.memory_space<vmem>>, vector<1x64x128xbf16>,
    %23 = vector.extract_strided_slice %5 {offsets = [0, 0], sizes = [8, 128], strides = [1, 1]} : vector<32x512xf32> to vector<8x128xf32>
    %24 = arith.truncf %23 : vector<8x128xf32> to vector<8x128xbf16>
    %c0_21 = arith.constant 0 : index
    %c0_22 = arith.constant 0 : index
    %c0_23 = arith.constant 0 : index
    %c0_24 = arith.constant 0 : index
    %25 = vector.load %arg9[%c0_21, %c0_22, %c0_23, %c0_24] : memref<4x4x8x128xbf16, #tpu.memory_space<vmem>>, vector<1x1x8x128xbf16>
    %26 = vector.shape_cast %25 : vector<1x1x8x128xbf16> to vector<8x128xbf16>
    %27 = vector.shape_cast %24 : vector<8x128xbf16> to vector<1x1x8x128xbf16>
    tpu.vector_store %arg9[%c0_21, %c0_22, %c0_23, %c0_24], %27 {strides = array<i32>} : memref<4x4x8x128xbf16, #tpu.memory_space<vmem>>, vector<1x1x8x128xbf16>,
    %28 = vector.extract_strided_slice %10 {offsets = [0, 0], sizes = [8, 128], strides = [1, 1]} : vector<32x512xf32> to vector<8x128xf32>
    %29 = arith.truncf %28 : vector<8x128xf32> to vector<8x128xbf16>
    %c0_25 = arith.constant 0 : index
    %c0_26 = arith.constant 0 : index
    %c0_27 = arith.constant 0 : index
    %c0_28 = arith.constant 0 : index
    %30 = vector.load %arg10[%c0_25, %c0_26, %c0_27, %c0_28] : memref<4x4x8x128xbf16, #tpu.memory_space<vmem>>, vector<1x1x8x128xbf16>
    %31 = vector.shape_cast %30 : vector<1x1x8x128xbf16> to vector<8x128xbf16>
    %32 = vector.shape_cast %29 : vector<8x128xbf16> to vector<1x1x8x128xbf16>
    tpu.vector_store %arg10[%c0_25, %c0_26, %c0_27, %c0_28], %32 {strides = array<i32>} : memref<4x4x8x128xbf16, #tpu.memory_space<vmem>>, vector<1x1x8x128xbf16>,
    %33 = vector.extract_strided_slice %12 {offsets = [0, 0], sizes = [8, 128], strides = [1, 1]} : vector<32x512xf32> to vector<8x128xf32>
    %34 = arith.truncf %33 : vector<8x128xf32> to vector<8x128xbf16>
    %c0_29 = arith.constant 0 : index
    %c0_30 = arith.constant 0 : index
    %c0_31 = arith.constant 0 : index
    %c0_32 = arith.constant 0 : index
    %35 = vector.load %arg11[%c0_29, %c0_30, %c0_31, %c0_32] : memref<4x4x8x128xbf16, #tpu.memory_space<vmem>>, vector<1x1x8x128xbf16>
    %36 = vector.shape_cast %35 : vector<1x1x8x128xbf16> to vector<8x128xbf16>
    %37 = vector.shape_cast %34 : vector<8x128xbf16> to vector<1x1x8x128xbf16>
    tpu.vector_store %arg11[%c0_29, %c0_30, %c0_31, %c0_32], %37 {strides = array<i32>} : memref<4x4x8x128xbf16, #tpu.memory_space<vmem>>, vector<1x1x8x128xbf16>,
    %38 = vector.extract_strided_slice %5 {offsets = [8, 0], sizes = [8, 128], strides = [1, 1]} : vector<32x512xf32> to vector<8x128xf32>
    %39 = arith.truncf %38 : vector<8x128xf32> to vector<8x128xbf16>
    %c0_33 = arith.constant 0 : index
    %c1 = arith.constant 1 : index
    %c0_34 = arith.constant 0 : index
    %c0_35 = arith.constant 0 : index
    %40 = vector.load %arg9[%c0_33, %c1, %c0_34, %c0_35] : memref<4x4x8x128xbf16, #tpu.memory_space<vmem>>, vector<1x1x8x128xbf16>
    %41 = vector.shape_cast %40 : vector<1x1x8x128xbf16> to vector<8x128xbf16>
    %42 = vector.shape_cast %39 : vector<8x128xbf16> to vector<1x1x8x128xbf16>
    tpu.vector_store %arg9[%c0_33, %c1, %c0_34, %c0_35], %42 {strides = array<i32>} : memref<4x4x8x128xbf16, #tpu.memory_space<vmem>>, vector<1x1x8x128xbf16>,
    %43 = vector.extract_strided_slice %10 {offsets = [8, 0], sizes = [8, 128], strides = [1, 1]} : vector<32x512xf32> to vector<8x128xf32>
    %44 = arith.truncf %43 : vector<8x128xf32> to vector<8x128xbf16>
    %c0_36 = arith.constant 0 : index
    %c1_37 = arith.constant 1 : index
    %c0_38 = arith.constant 0 : index
    %c0_39 = arith.constant 0 : index
    %45 = vector.load %arg10[%c0_36, %c1_37, %c0_38, %c0_39] : memref<4x4x8x128xbf16, #tpu.memory_space<vmem>>, vector<1x1x8x128xbf16>
    %46 = vector.shape_cast %45 : vector<1x1x8x128xbf16> to vector<8x128xbf16>
    %47 = vector.shape_cast %44 : vector<8x128xbf16> to vector<1x1x8x128xbf16>
    tpu.vector_store %arg10[%c0_36, %c1_37, %c0_38, %c0_39], %47 {strides = array<i32>} : memref<4x4x8x128xbf16, #tpu.memory_space<vmem>>, vector<1x1x8x128xbf16>,
    %48 = vector.extract_strided_slice %12 {offsets = [8, 0], sizes = [8, 128], strides = [1, 1]} : vector<32x512xf32> to vector<8x128xf32>
    %49 = arith.truncf %48 : vector<8x128xf32> to vector<8x128xbf16>
    %c0_40 = arith.constant 0 : index
    %c1_41 = arith.constant 1 : index
    %c0_42 = arith.constant 0 : index
    %c0_43 = arith.constant 0 : index
    %50 = vector.load %arg11[%c0_40, %c1_41, %c0_42, %c0_43] : memref<4x4x8x128xbf16, #tpu.memory_space<vmem>>, vector<1x1x8x128xbf16>
    %51 = vector.shape_cast %50 : vector<1x1x8x128xbf16> to vector<8x128xbf16>
    %52 = vector.shape_cast %49 : vector<8x128xbf16> to vector<1x1x8x128xbf16>
    tpu.vector_store %arg11[%c0_40, %c1_41, %c0_42, %c0_43], %52 {strides = array<i32>} : memref<4x4x8x128xbf16, #tpu.memory_space<vmem>>, vector<1x1x8x128xbf16>,
    %53 = vector.extract_strided_slice %5 {offsets = [16, 0], sizes = [8, 128], strides = [1, 1]} : vector<32x512xf32> to vector<8x128xf32>
    %54 = arith.truncf %53 : vector<8x128xf32> to vector<8x128xbf16>
    %c0_44 = arith.constant 0 : index
    %c2 = arith.constant 2 : index
    %c0_45 = arith.constant 0 : index
    %c0_46 = arith.constant 0 : index
    %55 = vector.load %arg9[%c0_44, %c2, %c0_45, %c0_46] : memref<4x4x8x128xbf16, #tpu.memory_space<vmem>>, vector<1x1x8x128xbf16>
    %56 = vector.shape_cast %55 : vector<1x1x8x128xbf16> to vector<8x128xbf16>
    %57 = vector.shape_cast %54 : vector<8x128xbf16> to vector<1x1x8x128xbf16>
    tpu.vector_store %arg9[%c0_44, %c2, %c0_45, %c0_46], %57 {strides = array<i32>} : memref<4x4x8x128xbf16, #tpu.memory_space<vmem>>, vector<1x1x8x128xbf16>,
    %58 = vector.extract_strided_slice %10 {offsets = [16, 0], sizes = [8, 128], strides = [1, 1]} : vector<32x512xf32> to vector<8x128xf32>
    %59 = arith.truncf %58 : vector<8x128xf32> to vector<8x128xbf16>
    %c0_47 = arith.constant 0 : index
    %c2_48 = arith.constant 2 : index
    %c0_49 = arith.constant 0 : index
    %c0_50 = arith.constant 0 : index
    %60 = vector.load %arg10[%c0_47, %c2_48, %c0_49, %c0_50] : memref<4x4x8x128xbf16, #tpu.memory_space<vmem>>, vector<1x1x8x128xbf16>
    %61 = vector.shape_cast %60 : vector<1x1x8x128xbf16> to vector<8x128xbf16>
    %62 = vector.shape_cast %59 : vector<8x128xbf16> to vector<1x1x8x128xbf16>
    tpu.vector_store %arg10[%c0_47, %c2_48, %c0_49, %c0_50], %62 {strides = array<i32>} : memref<4x4x8x128xbf16, #tpu.memory_space<vmem>>, vector<1x1x8x128xbf16>,
    %63 = vector.extract_strided_slice %12 {offsets = [16, 0], sizes = [8, 128], strides = [1, 1]} : vector<32x512xf32> to vector<8x128xf32>
    %64 = arith.truncf %63 : vector<8x128xf32> to vector<8x128xbf16>
    %c0_51 = arith.constant 0 : index
    %c2_52 = arith.constant 2 : index
    %c0_53 = arith.constant 0 : index
    %c0_54 = arith.constant 0 : index
    %65 = vector.load %arg11[%c0_51, %c2_52, %c0_53, %c0_54] : memref<4x4x8x128xbf16, #tpu.memory_space<vmem>>, vector<1x1x8x128xbf16>
    %66 = vector.shape_cast %65 : vector<1x1x8x128xbf16> to vector<8x128xbf16>
    %67 = vector.shape_cast %64 : vector<8x128xbf16> to vector<1x1x8x128xbf16>
    tpu.vector_store %arg11[%c0_51, %c2_52, %c0_53, %c0_54], %67 {strides = array<i32>} : memref<4x4x8x128xbf16, #tpu.memory_space<vmem>>, vector<1x1x8x128xbf16>,
    %68 = vector.extract_strided_slice %5 {offsets = [24, 0], sizes = [8, 128], strides = [1, 1]} : vector<32x512xf32> to vector<8x128xf32>
    %69 = arith.truncf %68 : vector<8x128xf32> to vector<8x128xbf16>
    %c0_55 = arith.constant 0 : index
    %c3 = arith.constant 3 : index
    %c0_56 = arith.constant 0 : index
    %c0_57 = arith.constant 0 : index
    %70 = vector.load %arg9[%c0_55, %c3, %c0_56, %c0_57] : memref<4x4x8x128xbf16, #tpu.memory_space<vmem>>, vector<1x1x8x128xbf16>
    %71 = vector.shape_cast %70 : vector<1x1x8x128xbf16> to vector<8x128xbf16>
    %72 = vector.shape_cast %69 : vector<8x128xbf16> to vector<1x1x8x128xbf16>
    tpu.vector_store %arg9[%c0_55, %c3, %c0_56, %c0_57], %72 {strides = array<i32>} : memref<4x4x8x128xbf16, #tpu.memory_space<vmem>>, vector<1x1x8x128xbf16>,
    %73 = vector.extract_strided_slice %10 {offsets = [24, 0], sizes = [8, 128], strides = [1, 1]} : vector<32x512xf32> to vector<8x128xf32>
    %74 = arith.truncf %73 : vector<8x128xf32> to vector<8x128xbf16>
    %c0_58 = arith.constant 0 : index
    %c3_59 = arith.constant 3 : index
    %c0_60 = arith.constant 0 : index
    %c0_61 = arith.constant 0 : index
    %75 = vector.load %arg10[%c0_58, %c3_59, %c0_60, %c0_61] : memref<4x4x8x128xbf16, #tpu.memory_space<vmem>>, vector<1x1x8x128xbf16>
    %76 = vector.shape_cast %75 : vector<1x1x8x128xbf16> to vector<8x128xbf16>
    %77 = vector.shape_cast %74 : vector<8x128xbf16> to vector<1x1x8x128xbf16>
    tpu.vector_store %arg10[%c0_58, %c3_59, %c0_60, %c0_61], %77 {strides = array<i32>} : memref<4x4x8x128xbf16, #tpu.memory_space<vmem>>, vector<1x1x8x128xbf16>,
    %78 = vector.extract_strided_slice %12 {offsets = [24, 0], sizes = [8, 128], strides = [1, 1]} : vector<32x512xf32> to vector<8x128xf32>
    %79 = arith.truncf %78 : vector<8x128xf32> to vector<8x128xbf16>
    %c0_62 = arith.constant 0 : index
    %c3_63 = arith.constant 3 : index
    %c0_64 = arith.constant 0 : index
    %c0_65 = arith.constant 0 : index
    %80 = vector.load %arg11[%c0_62, %c3_63, %c0_64, %c0_65] : memref<4x4x8x128xbf16, #tpu.memory_space<vmem>>, vector<1x1x8x128xbf16>
    %81 = vector.shape_cast %80 : vector<1x1x8x128xbf16> to vector<8x128xbf16>
    %82 = vector.shape_cast %79 : vector<8x128xbf16> to vector<1x1x8x128xbf16>
    tpu.vector_store %arg11[%c0_62, %c3_63, %c0_64, %c0_65], %82 {strides = array<i32>} : memref<4x4x8x128xbf16, #tpu.memory_space<vmem>>, vector<1x1x8x128xbf16>,
    %83 = vector.extract_strided_slice %17 {offsets = [0, 128], sizes = [64, 128], strides = [1, 1]} : vector<64x512xf32> to vector<64x128xf32>
    %84 = arith.truncf %83 : vector<64x128xf32> to vector<64x128xbf16>
    %c1_66 = arith.constant 1 : index
    %c0_67 = arith.constant 0 : index
    %c0_68 = arith.constant 0 : index
    %85 = vector.load %arg12[%c1_66, %c0_67, %c0_68] : memref<4x64x128xbf16, #tpu.memory_space<vmem>>, vector<1x64x128xbf16>
    %86 = vector.shape_cast %85 : vector<1x64x128xbf16> to vector<64x128xbf16>
    %87 = vector.shape_cast %84 : vector<64x128xbf16> to vector<1x64x128xbf16>
    tpu.vector_store %arg12[%c1_66, %c0_67, %c0_68], %87 {strides = array<i32>} : memref<4x64x128xbf16, #tpu.memory_space<vmem>>, vector<1x64x128xbf16>,
    %88 = vector.extract_strided_slice %5 {offsets = [0, 128], sizes = [8, 128], strides = [1, 1]} : vector<32x512xf32> to vector<8x128xf32>
    %89 = arith.truncf %88 : vector<8x128xf32> to vector<8x128xbf16>
    %c1_69 = arith.constant 1 : index
    %c0_70 = arith.constant 0 : index
    %c0_71 = arith.constant 0 : index
    %c0_72 = arith.constant 0 : index
    %90 = vector.load %arg9[%c1_69, %c0_70, %c0_71, %c0_72] : memref<4x4x8x128xbf16, #tpu.memory_space<vmem>>, vector<1x1x8x128xbf16>
    %91 = vector.shape_cast %90 : vector<1x1x8x128xbf16> to vector<8x128xbf16>
    %92 = vector.shape_cast %89 : vector<8x128xbf16> to vector<1x1x8x128xbf16>
    tpu.vector_store %arg9[%c1_69, %c0_70, %c0_71, %c0_72], %92 {strides = array<i32>} : memref<4x4x8x128xbf16, #tpu.memory_space<vmem>>, vector<1x1x8x128xbf16>,
    %93 = vector.extract_strided_slice %10 {offsets = [0, 128], sizes = [8, 128], strides = [1, 1]} : vector<32x512xf32> to vector<8x128xf32>
    %94 = arith.truncf %93 : vector<8x128xf32> to vector<8x128xbf16>
    %c1_73 = arith.constant 1 : index
    %c0_74 = arith.constant 0 : index
    %c0_75 = arith.constant 0 : index
    %c0_76 = arith.constant 0 : index
    %95 = vector.load %arg10[%c1_73, %c0_74, %c0_75, %c0_76] : memref<4x4x8x128xbf16, #tpu.memory_space<vmem>>, vector<1x1x8x128xbf16>
    %96 = vector.shape_cast %95 : vector<1x1x8x128xbf16> to vector<8x128xbf16>
    %97 = vector.shape_cast %94 : vector<8x128xbf16> to vector<1x1x8x128xbf16>
    tpu.vector_store %arg10[%c1_73, %c0_74, %c0_75, %c0_76], %97 {strides = array<i32>} : memref<4x4x8x128xbf16, #tpu.memory_space<vmem>>, vector<1x1x8x128xbf16>,
    %98 = vector.extract_strided_slice %12 {offsets = [0, 128], sizes = [8, 128], strides = [1, 1]} : vector<32x512xf32> to vector<8x128xf32>
    %99 = arith.truncf %98 : vector<8x128xf32> to vector<8x128xbf16>
    %c1_77 = arith.constant 1 : index
    %c0_78 = arith.constant 0 : index
    %c0_79 = arith.constant 0 : index
    %c0_80 = arith.constant 0 : index
    %100 = vector.load %arg11[%c1_77, %c0_78, %c0_79, %c0_80] : memref<4x4x8x128xbf16, #tpu.memory_space<vmem>>, vector<1x1x8x128xbf16>
    %101 = vector.shape_cast %100 : vector<1x1x8x128xbf16> to vector<8x128xbf16>
    %102 = vector.shape_cast %99 : vector<8x128xbf16> to vector<1x1x8x128xbf16>
    tpu.vector_store %arg11[%c1_77, %c0_78, %c0_79, %c0_80], %102 {strides = array<i32>} : memref<4x4x8x128xbf16, #tpu.memory_space<vmem>>, vector<1x1x8x128xbf16>,
    %103 = vector.extract_strided_slice %5 {offsets = [8, 128], sizes = [8, 128], strides = [1, 1]} : vector<32x512xf32> to vector<8x128xf32>
    %104 = arith.truncf %103 : vector<8x128xf32> to vector<8x128xbf16>
    %c1_81 = arith.constant 1 : index
    %c1_82 = arith.constant 1 : index
    %c0_83 = arith.constant 0 : index
    %c0_84 = arith.constant 0 : index
    %105 = vector.load %arg9[%c1_81, %c1_82, %c0_83, %c0_84] : memref<4x4x8x128xbf16, #tpu.memory_space<vmem>>, vector<1x1x8x128xbf16>
    %106 = vector.shape_cast %105 : vector<1x1x8x128xbf16> to vector<8x128xbf16>
    %107 = vector.shape_cast %104 : vector<8x128xbf16> to vector<1x1x8x128xbf16>
    tpu.vector_store %arg9[%c1_81, %c1_82, %c0_83, %c0_84], %107 {strides = array<i32>} : memref<4x4x8x128xbf16, #tpu.memory_space<vmem>>, vector<1x1x8x128xbf16>,
    %108 = vector.extract_strided_slice %10 {offsets = [8, 128], sizes = [8, 128], strides = [1, 1]} : vector<32x512xf32> to vector<8x128xf32>
    %109 = arith.truncf %108 : vector<8x128xf32> to vector<8x128xbf16>
    %c1_85 = arith.constant 1 : index
    %c1_86 = arith.constant 1 : index
    %c0_87 = arith.constant 0 : index
    %c0_88 = arith.constant 0 : index
    %110 = vector.load %arg10[%c1_85, %c1_86, %c0_87, %c0_88] : memref<4x4x8x128xbf16, #tpu.memory_space<vmem>>, vector<1x1x8x128xbf16>
    %111 = vector.shape_cast %110 : vector<1x1x8x128xbf16> to vector<8x128xbf16>
    %112 = vector.shape_cast %109 : vector<8x128xbf16> to vector<1x1x8x128xbf16>
    tpu.vector_store %arg10[%c1_85, %c1_86, %c0_87, %c0_88], %112 {strides = array<i32>} : memref<4x4x8x128xbf16, #tpu.memory_space<vmem>>, vector<1x1x8x128xbf16>,
    %113 = vector.extract_strided_slice %12 {offsets = [8, 128], sizes = [8, 128], strides = [1, 1]} : vector<32x512xf32> to vector<8x128xf32>
    %114 = arith.truncf %113 : vector<8x128xf32> to vector<8x128xbf16>
    %c1_89 = arith.constant 1 : index
    %c1_90 = arith.constant 1 : index
    %c0_91 = arith.constant 0 : index
    %c0_92 = arith.constant 0 : index
    %115 = vector.load %arg11[%c1_89, %c1_90, %c0_91, %c0_92] : memref<4x4x8x128xbf16, #tpu.memory_space<vmem>>, vector<1x1x8x128xbf16>
    %116 = vector.shape_cast %115 : vector<1x1x8x128xbf16> to vector<8x128xbf16>
    %117 = vector.shape_cast %114 : vector<8x128xbf16> to vector<1x1x8x128xbf16>
    tpu.vector_store %arg11[%c1_89, %c1_90, %c0_91, %c0_92], %117 {strides = array<i32>} : memref<4x4x8x128xbf16, #tpu.memory_space<vmem>>, vector<1x1x8x128xbf16>,
    %118 = vector.extract_strided_slice %5 {offsets = [16, 128], sizes = [8, 128], strides = [1, 1]} : vector<32x512xf32> to vector<8x128xf32>
    %119 = arith.truncf %118 : vector<8x128xf32> to vector<8x128xbf16>
    %c1_93 = arith.constant 1 : index
    %c2_94 = arith.constant 2 : index
    %c0_95 = arith.constant 0 : index
    %c0_96 = arith.constant 0 : index
    %120 = vector.load %arg9[%c1_93, %c2_94, %c0_95, %c0_96] : memref<4x4x8x128xbf16, #tpu.memory_space<vmem>>, vector<1x1x8x128xbf16>
    %121 = vector.shape_cast %120 : vector<1x1x8x128xbf16> to vector<8x128xbf16>
    %122 = vector.shape_cast %119 : vector<8x128xbf16> to vector<1x1x8x128xbf16>
    tpu.vector_store %arg9[%c1_93, %c2_94, %c0_95, %c0_96], %122 {strides = array<i32>} : memref<4x4x8x128xbf16, #tpu.memory_space<vmem>>, vector<1x1x8x128xbf16>,
    %123 = vector.extract_strided_slice %10 {offsets = [16, 128], sizes = [8, 128], strides = [1, 1]} : vector<32x512xf32> to vector<8x128xf32>
    %124 = arith.truncf %123 : vector<8x128xf32> to vector<8x128xbf16>
    %c1_97 = arith.constant 1 : index
    %c2_98 = arith.constant 2 : index
    %c0_99 = arith.constant 0 : index
    %c0_100 = arith.constant 0 : index
    %125 = vector.load %arg10[%c1_97, %c2_98, %c0_99, %c0_100] : memref<4x4x8x128xbf16, #tpu.memory_space<vmem>>, vector<1x1x8x128xbf16>
    %126 = vector.shape_cast %125 : vector<1x1x8x128xbf16> to vector<8x128xbf16>
    %127 = vector.shape_cast %124 : vector<8x128xbf16> to vector<1x1x8x128xbf16>
    tpu.vector_store %arg10[%c1_97, %c2_98, %c0_99, %c0_100], %127 {strides = array<i32>} : memref<4x4x8x128xbf16, #tpu.memory_space<vmem>>, vector<1x1x8x128xbf16>,
    %128 = vector.extract_strided_slice %12 {offsets = [16, 128], sizes = [8, 128], strides = [1, 1]} : vector<32x512xf32> to vector<8x128xf32>
    %129 = arith.truncf %128 : vector<8x128xf32> to vector<8x128xbf16>
    %c1_101 = arith.constant 1 : index
    %c2_102 = arith.constant 2 : index
    %c0_103 = arith.constant 0 : index
    %c0_104 = arith.constant 0 : index
    %130 = vector.load %arg11[%c1_101, %c2_102, %c0_103, %c0_104] : memref<4x4x8x128xbf16, #tpu.memory_space<vmem>>, vector<1x1x8x128xbf16>
    %131 = vector.shape_cast %130 : vector<1x1x8x128xbf16> to vector<8x128xbf16>
    %132 = vector.shape_cast %129 : vector<8x128xbf16> to vector<1x1x8x128xbf16>
    tpu.vector_store %arg11[%c1_101, %c2_102, %c0_103, %c0_104], %132 {strides = array<i32>} : memref<4x4x8x128xbf16, #tpu.memory_space<vmem>>, vector<1x1x8x128xbf16>,
    %133 = vector.extract_strided_slice %5 {offsets = [24, 128], sizes = [8, 128], strides = [1, 1]} : vector<32x512xf32> to vector<8x128xf32>
    %134 = arith.truncf %133 : vector<8x128xf32> to vector<8x128xbf16>
    %c1_105 = arith.constant 1 : index
    %c3_106 = arith.constant 3 : index
    %c0_107 = arith.constant 0 : index
    %c0_108 = arith.constant 0 : index
    %135 = vector.load %arg9[%c1_105, %c3_106, %c0_107, %c0_108] : memref<4x4x8x128xbf16, #tpu.memory_space<vmem>>, vector<1x1x8x128xbf16>
    %136 = vector.shape_cast %135 : vector<1x1x8x128xbf16> to vector<8x128xbf16>
    %137 = vector.shape_cast %134 : vector<8x128xbf16> to vector<1x1x8x128xbf16>
    tpu.vector_store %arg9[%c1_105, %c3_106, %c0_107, %c0_108], %137 {strides = array<i32>} : memref<4x4x8x128xbf16, #tpu.memory_space<vmem>>, vector<1x1x8x128xbf16>,
    %138 = vector.extract_strided_slice %10 {offsets = [24, 128], sizes = [8, 128], strides = [1, 1]} : vector<32x512xf32> to vector<8x128xf32>
    %139 = arith.truncf %138 : vector<8x128xf32> to vector<8x128xbf16>
    %c1_109 = arith.constant 1 : index
    %c3_110 = arith.constant 3 : index
    %c0_111 = arith.constant 0 : index
    %c0_112 = arith.constant 0 : index
    %140 = vector.load %arg10[%c1_109, %c3_110, %c0_111, %c0_112] : memref<4x4x8x128xbf16, #tpu.memory_space<vmem>>, vector<1x1x8x128xbf16>
    %141 = vector.shape_cast %140 : vector<1x1x8x128xbf16> to vector<8x128xbf16>
    %142 = vector.shape_cast %139 : vector<8x128xbf16> to vector<1x1x8x128xbf16>
    tpu.vector_store %arg10[%c1_109, %c3_110, %c0_111, %c0_112], %142 {strides = array<i32>} : memref<4x4x8x128xbf16, #tpu.memory_space<vmem>>, vector<1x1x8x128xbf16>,
    %143 = vector.extract_strided_slice %12 {offsets = [24, 128], sizes = [8, 128], strides = [1, 1]} : vector<32x512xf32> to vector<8x128xf32>
    %144 = arith.truncf %143 : vector<8x128xf32> to vector<8x128xbf16>
    %c1_113 = arith.constant 1 : index
    %c3_114 = arith.constant 3 : index
    %c0_115 = arith.constant 0 : index
    %c0_116 = arith.constant 0 : index
    %145 = vector.load %arg11[%c1_113, %c3_114, %c0_115, %c0_116] : memref<4x4x8x128xbf16, #tpu.memory_space<vmem>>, vector<1x1x8x128xbf16>
    %146 = vector.shape_cast %145 : vector<1x1x8x128xbf16> to vector<8x128xbf16>
    %147 = vector.shape_cast %144 : vector<8x128xbf16> to vector<1x1x8x128xbf16>
    tpu.vector_store %arg11[%c1_113, %c3_114, %c0_115, %c0_116], %147 {strides = array<i32>} : memref<4x4x8x128xbf16, #tpu.memory_space<vmem>>, vector<1x1x8x128xbf16>,
    %148 = vector.extract_strided_slice %17 {offsets = [0, 256], sizes = [64, 128], strides = [1, 1]} : vector<64x512xf32> to vector<64x128xf32>
    %149 = arith.truncf %148 : vector<64x128xf32> to vector<64x128xbf16>
    %c2_117 = arith.constant 2 : index
    %c0_118 = arith.constant 0 : index
    %c0_119 = arith.constant 0 : index
    %150 = vector.load %arg12[%c2_117, %c0_118, %c0_119] : memref<4x64x128xbf16, #tpu.memory_space<vmem>>, vector<1x64x128xbf16>
    %151 = vector.shape_cast %150 : vector<1x64x128xbf16> to vector<64x128xbf16>
    %152 = vector.shape_cast %149 : vector<64x128xbf16> to vector<1x64x128xbf16>
    tpu.vector_store %arg12[%c2_117, %c0_118, %c0_119], %152 {strides = array<i32>} : memref<4x64x128xbf16, #tpu.memory_space<vmem>>, vector<1x64x128xbf16>,
    %153 = vector.extract_strided_slice %5 {offsets = [0, 256], sizes = [8, 128], strides = [1, 1]} : vector<32x512xf32> to vector<8x128xf32>
    %154 = arith.truncf %153 : vector<8x128xf32> to vector<8x128xbf16>
    %c2_120 = arith.constant 2 : index
    %c0_121 = arith.constant 0 : index
    %c0_122 = arith.constant 0 : index
    %c0_123 = arith.constant 0 : index
    %155 = vector.load %arg9[%c2_120, %c0_121, %c0_122, %c0_123] : memref<4x4x8x128xbf16, #tpu.memory_space<vmem>>, vector<1x1x8x128xbf16>
    %156 = vector.shape_cast %155 : vector<1x1x8x128xbf16> to vector<8x128xbf16>
    %157 = vector.shape_cast %154 : vector<8x128xbf16> to vector<1x1x8x128xbf16>
    tpu.vector_store %arg9[%c2_120, %c0_121, %c0_122, %c0_123], %157 {strides = array<i32>} : memref<4x4x8x128xbf16, #tpu.memory_space<vmem>>, vector<1x1x8x128xbf16>,
    %158 = vector.extract_strided_slice %10 {offsets = [0, 256], sizes = [8, 128], strides = [1, 1]} : vector<32x512xf32> to vector<8x128xf32>
    %159 = arith.truncf %158 : vector<8x128xf32> to vector<8x128xbf16>
    %c2_124 = arith.constant 2 : index
    %c0_125 = arith.constant 0 : index
    %c0_126 = arith.constant 0 : index
    %c0_127 = arith.constant 0 : index
    %160 = vector.load %arg10[%c2_124, %c0_125, %c0_126, %c0_127] : memref<4x4x8x128xbf16, #tpu.memory_space<vmem>>, vector<1x1x8x128xbf16>
    %161 = vector.shape_cast %160 : vector<1x1x8x128xbf16> to vector<8x128xbf16>
    %162 = vector.shape_cast %159 : vector<8x128xbf16> to vector<1x1x8x128xbf16>
    tpu.vector_store %arg10[%c2_124, %c0_125, %c0_126, %c0_127], %162 {strides = array<i32>} : memref<4x4x8x128xbf16, #tpu.memory_space<vmem>>, vector<1x1x8x128xbf16>,
    %163 = vector.extract_strided_slice %12 {offsets = [0, 256], sizes = [8, 128], strides = [1, 1]} : vector<32x512xf32> to vector<8x128xf32>
    %164 = arith.truncf %163 : vector<8x128xf32> to vector<8x128xbf16>
    %c2_128 = arith.constant 2 : index
    %c0_129 = arith.constant 0 : index
    %c0_130 = arith.constant 0 : index
    %c0_131 = arith.constant 0 : index
    %165 = vector.load %arg11[%c2_128, %c0_129, %c0_130, %c0_131] : memref<4x4x8x128xbf16, #tpu.memory_space<vmem>>, vector<1x1x8x128xbf16>
    %166 = vector.shape_cast %165 : vector<1x1x8x128xbf16> to vector<8x128xbf16>
    %167 = vector.shape_cast %164 : vector<8x128xbf16> to vector<1x1x8x128xbf16>
    tpu.vector_store %arg11[%c2_128, %c0_129, %c0_130, %c0_131], %167 {strides = array<i32>} : memref<4x4x8x128xbf16, #tpu.memory_space<vmem>>, vector<1x1x8x128xbf16>,
    %168 = vector.extract_strided_slice %5 {offsets = [8, 256], sizes = [8, 128], strides = [1, 1]} : vector<32x512xf32> to vector<8x128xf32>
    %169 = arith.truncf %168 : vector<8x128xf32> to vector<8x128xbf16>
    %c2_132 = arith.constant 2 : index
    %c1_133 = arith.constant 1 : index
    %c0_134 = arith.constant 0 : index
    %c0_135 = arith.constant 0 : index
    %170 = vector.load %arg9[%c2_132, %c1_133, %c0_134, %c0_135] : memref<4x4x8x128xbf16, #tpu.memory_space<vmem>>, vector<1x1x8x128xbf16>
    %171 = vector.shape_cast %170 : vector<1x1x8x128xbf16> to vector<8x128xbf16>
    %172 = vector.shape_cast %169 : vector<8x128xbf16> to vector<1x1x8x128xbf16>
    tpu.vector_store %arg9[%c2_132, %c1_133, %c0_134, %c0_135], %172 {strides = array<i32>} : memref<4x4x8x128xbf16, #tpu.memory_space<vmem>>, vector<1x1x8x128xbf16>,
    %173 = vector.extract_strided_slice %10 {offsets = [8, 256], sizes = [8, 128], strides = [1, 1]} : vector<32x512xf32> to vector<8x128xf32>
    %174 = arith.truncf %173 : vector<8x128xf32> to vector<8x128xbf16>
    %c2_136 = arith.constant 2 : index
    %c1_137 = arith.constant 1 : index
    %c0_138 = arith.constant 0 : index
    %c0_139 = arith.constant 0 : index
    %175 = vector.load %arg10[%c2_136, %c1_137, %c0_138, %c0_139] : memref<4x4x8x128xbf16, #tpu.memory_space<vmem>>, vector<1x1x8x128xbf16>
    %176 = vector.shape_cast %175 : vector<1x1x8x128xbf16> to vector<8x128xbf16>
    %177 = vector.shape_cast %174 : vector<8x128xbf16> to vector<1x1x8x128xbf16>
    tpu.vector_store %arg10[%c2_136, %c1_137, %c0_138, %c0_139], %177 {strides = array<i32>} : memref<4x4x8x128xbf16, #tpu.memory_space<vmem>>, vector<1x1x8x128xbf16>,
    %178 = vector.extract_strided_slice %12 {offsets = [8, 256], sizes = [8, 128], strides = [1, 1]} : vector<32x512xf32> to vector<8x128xf32>
    %179 = arith.truncf %178 : vector<8x128xf32> to vector<8x128xbf16>
    %c2_140 = arith.constant 2 : index
    %c1_141 = arith.constant 1 : index
    %c0_142 = arith.constant 0 : index
    %c0_143 = arith.constant 0 : index
    %180 = vector.load %arg11[%c2_140, %c1_141, %c0_142, %c0_143] : memref<4x4x8x128xbf16, #tpu.memory_space<vmem>>, vector<1x1x8x128xbf16>
    %181 = vector.shape_cast %180 : vector<1x1x8x128xbf16> to vector<8x128xbf16>
    %182 = vector.shape_cast %179 : vector<8x128xbf16> to vector<1x1x8x128xbf16>
    tpu.vector_store %arg11[%c2_140, %c1_141, %c0_142, %c0_143], %182 {strides = array<i32>} : memref<4x4x8x128xbf16, #tpu.memory_space<vmem>>, vector<1x1x8x128xbf16>,
    %183 = vector.extract_strided_slice %5 {offsets = [16, 256], sizes = [8, 128], strides = [1, 1]} : vector<32x512xf32> to vector<8x128xf32>
    %184 = arith.truncf %183 : vector<8x128xf32> to vector<8x128xbf16>
    %c2_144 = arith.constant 2 : index
    %c2_145 = arith.constant 2 : index
    %c0_146 = arith.constant 0 : index
    %c0_147 = arith.constant 0 : index
    %185 = vector.load %arg9[%c2_144, %c2_145, %c0_146, %c0_147] : memref<4x4x8x128xbf16, #tpu.memory_space<vmem>>, vector<1x1x8x128xbf16>
    %186 = vector.shape_cast %185 : vector<1x1x8x128xbf16> to vector<8x128xbf16>
    %187 = vector.shape_cast %184 : vector<8x128xbf16> to vector<1x1x8x128xbf16>
    tpu.vector_store %arg9[%c2_144, %c2_145, %c0_146, %c0_147], %187 {strides = array<i32>} : memref<4x4x8x128xbf16, #tpu.memory_space<vmem>>, vector<1x1x8x128xbf16>,
    %188 = vector.extract_strided_slice %10 {offsets = [16, 256], sizes = [8, 128], strides = [1, 1]} : vector<32x512xf32> to vector<8x128xf32>
    %189 = arith.truncf %188 : vector<8x128xf32> to vector<8x128xbf16>
    %c2_148 = arith.constant 2 : index
    %c2_149 = arith.constant 2 : index
    %c0_150 = arith.constant 0 : index
    %c0_151 = arith.constant 0 : index
    %190 = vector.load %arg10[%c2_148, %c2_149, %c0_150, %c0_151] : memref<4x4x8x128xbf16, #tpu.memory_space<vmem>>, vector<1x1x8x128xbf16>
    %191 = vector.shape_cast %190 : vector<1x1x8x128xbf16> to vector<8x128xbf16>
    %192 = vector.shape_cast %189 : vector<8x128xbf16> to vector<1x1x8x128xbf16>
    tpu.vector_store %arg10[%c2_148, %c2_149, %c0_150, %c0_151], %192 {strides = array<i32>} : memref<4x4x8x128xbf16, #tpu.memory_space<vmem>>, vector<1x1x8x128xbf16>,
    %193 = vector.extract_strided_slice %12 {offsets = [16, 256], sizes = [8, 128], strides = [1, 1]} : vector<32x512xf32> to vector<8x128xf32>
    %194 = arith.truncf %193 : vector<8x128xf32> to vector<8x128xbf16>
    %c2_152 = arith.constant 2 : index
    %c2_153 = arith.constant 2 : index
    %c0_154 = arith.constant 0 : index
    %c0_155 = arith.constant 0 : index
    %195 = vector.load %arg11[%c2_152, %c2_153, %c0_154, %c0_155] : memref<4x4x8x128xbf16, #tpu.memory_space<vmem>>, vector<1x1x8x128xbf16>
    %196 = vector.shape_cast %195 : vector<1x1x8x128xbf16> to vector<8x128xbf16>
    %197 = vector.shape_cast %194 : vector<8x128xbf16> to vector<1x1x8x128xbf16>
    tpu.vector_store %arg11[%c2_152, %c2_153, %c0_154, %c0_155], %197 {strides = array<i32>} : memref<4x4x8x128xbf16, #tpu.memory_space<vmem>>, vector<1x1x8x128xbf16>,
    %198 = vector.extract_strided_slice %5 {offsets = [24, 256], sizes = [8, 128], strides = [1, 1]} : vector<32x512xf32> to vector<8x128xf32>
    %199 = arith.truncf %198 : vector<8x128xf32> to vector<8x128xbf16>
    %c2_156 = arith.constant 2 : index
    %c3_157 = arith.constant 3 : index
    %c0_158 = arith.constant 0 : index
    %c0_159 = arith.constant 0 : index
    %200 = vector.load %arg9[%c2_156, %c3_157, %c0_158, %c0_159] : memref<4x4x8x128xbf16, #tpu.memory_space<vmem>>, vector<1x1x8x128xbf16>
    %201 = vector.shape_cast %200 : vector<1x1x8x128xbf16> to vector<8x128xbf16>
    %202 = vector.shape_cast %199 : vector<8x128xbf16> to vector<1x1x8x128xbf16>
    tpu.vector_store %arg9[%c2_156, %c3_157, %c0_158, %c0_159], %202 {strides = array<i32>} : memref<4x4x8x128xbf16, #tpu.memory_space<vmem>>, vector<1x1x8x128xbf16>,
    %203 = vector.extract_strided_slice %10 {offsets = [24, 256], sizes = [8, 128], strides = [1, 1]} : vector<32x512xf32> to vector<8x128xf32>
    %204 = arith.truncf %203 : vector<8x128xf32> to vector<8x128xbf16>
    %c2_160 = arith.constant 2 : index
    %c3_161 = arith.constant 3 : index
    %c0_162 = arith.constant 0 : index
    %c0_163 = arith.constant 0 : index
    %205 = vector.load %arg10[%c2_160, %c3_161, %c0_162, %c0_163] : memref<4x4x8x128xbf16, #tpu.memory_space<vmem>>, vector<1x1x8x128xbf16>
    %206 = vector.shape_cast %205 : vector<1x1x8x128xbf16> to vector<8x128xbf16>
    %207 = vector.shape_cast %204 : vector<8x128xbf16> to vector<1x1x8x128xbf16>
    tpu.vector_store %arg10[%c2_160, %c3_161, %c0_162, %c0_163], %207 {strides = array<i32>} : memref<4x4x8x128xbf16, #tpu.memory_space<vmem>>, vector<1x1x8x128xbf16>,
    %208 = vector.extract_strided_slice %12 {offsets = [24, 256], sizes = [8, 128], strides = [1, 1]} : vector<32x512xf32> to vector<8x128xf32>
    %209 = arith.truncf %208 : vector<8x128xf32> to vector<8x128xbf16>
    %c2_164 = arith.constant 2 : index
    %c3_165 = arith.constant 3 : index
    %c0_166 = arith.constant 0 : index
    %c0_167 = arith.constant 0 : index
    %210 = vector.load %arg11[%c2_164, %c3_165, %c0_166, %c0_167] : memref<4x4x8x128xbf16, #tpu.memory_space<vmem>>, vector<1x1x8x128xbf16>
    %211 = vector.shape_cast %210 : vector<1x1x8x128xbf16> to vector<8x128xbf16>
    %212 = vector.shape_cast %209 : vector<8x128xbf16> to vector<1x1x8x128xbf16>
    tpu.vector_store %arg11[%c2_164, %c3_165, %c0_166, %c0_167], %212 {strides = array<i32>} : memref<4x4x8x128xbf16, #tpu.memory_space<vmem>>, vector<1x1x8x128xbf16>,
    %213 = vector.extract_strided_slice %17 {offsets = [0, 384], sizes = [64, 128], strides = [1, 1]} : vector<64x512xf32> to vector<64x128xf32>
    %214 = arith.truncf %213 : vector<64x128xf32> to vector<64x128xbf16>
    %c3_168 = arith.constant 3 : index
    %c0_169 = arith.constant 0 : index
    %c0_170 = arith.constant 0 : index
    %215 = vector.load %arg12[%c3_168, %c0_169, %c0_170] : memref<4x64x128xbf16, #tpu.memory_space<vmem>>, vector<1x64x128xbf16>
    %216 = vector.shape_cast %215 : vector<1x64x128xbf16> to vector<64x128xbf16>
    %217 = vector.shape_cast %214 : vector<64x128xbf16> to vector<1x64x128xbf16>
    tpu.vector_store %arg12[%c3_168, %c0_169, %c0_170], %217 {strides = array<i32>} : memref<4x64x128xbf16, #tpu.memory_space<vmem>>, vector<1x64x128xbf16>,
    %218 = vector.extract_strided_slice %5 {offsets = [0, 384], sizes = [8, 128], strides = [1, 1]} : vector<32x512xf32> to vector<8x128xf32>
    %219 = arith.truncf %218 : vector<8x128xf32> to vector<8x128xbf16>
    %c3_171 = arith.constant 3 : index
    %c0_172 = arith.constant 0 : index
    %c0_173 = arith.constant 0 : index
    %c0_174 = arith.constant 0 : index
    %220 = vector.load %arg9[%c3_171, %c0_172, %c0_173, %c0_174] : memref<4x4x8x128xbf16, #tpu.memory_space<vmem>>, vector<1x1x8x128xbf16>
    %221 = vector.shape_cast %220 : vector<1x1x8x128xbf16> to vector<8x128xbf16>
    %222 = vector.shape_cast %219 : vector<8x128xbf16> to vector<1x1x8x128xbf16>
    tpu.vector_store %arg9[%c3_171, %c0_172, %c0_173, %c0_174], %222 {strides = array<i32>} : memref<4x4x8x128xbf16, #tpu.memory_space<vmem>>, vector<1x1x8x128xbf16>,
    %223 = vector.extract_strided_slice %10 {offsets = [0, 384], sizes = [8, 128], strides = [1, 1]} : vector<32x512xf32> to vector<8x128xf32>
    %224 = arith.truncf %223 : vector<8x128xf32> to vector<8x128xbf16>
    %c3_175 = arith.constant 3 : index
    %c0_176 = arith.constant 0 : index
    %c0_177 = arith.constant 0 : index
    %c0_178 = arith.constant 0 : index
    %225 = vector.load %arg10[%c3_175, %c0_176, %c0_177, %c0_178] : memref<4x4x8x128xbf16, #tpu.memory_space<vmem>>, vector<1x1x8x128xbf16>
    %226 = vector.shape_cast %225 : vector<1x1x8x128xbf16> to vector<8x128xbf16>
    %227 = vector.shape_cast %224 : vector<8x128xbf16> to vector<1x1x8x128xbf16>
    tpu.vector_store %arg10[%c3_175, %c0_176, %c0_177, %c0_178], %227 {strides = array<i32>} : memref<4x4x8x128xbf16, #tpu.memory_space<vmem>>, vector<1x1x8x128xbf16>,
    %228 = vector.extract_strided_slice %12 {offsets = [0, 384], sizes = [8, 128], strides = [1, 1]} : vector<32x512xf32> to vector<8x128xf32>
    %229 = arith.truncf %228 : vector<8x128xf32> to vector<8x128xbf16>
    %c3_179 = arith.constant 3 : index
    %c0_180 = arith.constant 0 : index
    %c0_181 = arith.constant 0 : index
    %c0_182 = arith.constant 0 : index
    %230 = vector.load %arg11[%c3_179, %c0_180, %c0_181, %c0_182] : memref<4x4x8x128xbf16, #tpu.memory_space<vmem>>, vector<1x1x8x128xbf16>
    %231 = vector.shape_cast %230 : vector<1x1x8x128xbf16> to vector<8x128xbf16>
    %232 = vector.shape_cast %229 : vector<8x128xbf16> to vector<1x1x8x128xbf16>
    tpu.vector_store %arg11[%c3_179, %c0_180, %c0_181, %c0_182], %232 {strides = array<i32>} : memref<4x4x8x128xbf16, #tpu.memory_space<vmem>>, vector<1x1x8x128xbf16>,
    %233 = vector.extract_strided_slice %5 {offsets = [8, 384], sizes = [8, 128], strides = [1, 1]} : vector<32x512xf32> to vector<8x128xf32>
    %234 = arith.truncf %233 : vector<8x128xf32> to vector<8x128xbf16>
    %c3_183 = arith.constant 3 : index
    %c1_184 = arith.constant 1 : index
    %c0_185 = arith.constant 0 : index
    %c0_186 = arith.constant 0 : index
    %235 = vector.load %arg9[%c3_183, %c1_184, %c0_185, %c0_186] : memref<4x4x8x128xbf16, #tpu.memory_space<vmem>>, vector<1x1x8x128xbf16>
    %236 = vector.shape_cast %235 : vector<1x1x8x128xbf16> to vector<8x128xbf16>
    %237 = vector.shape_cast %234 : vector<8x128xbf16> to vector<1x1x8x128xbf16>
    tpu.vector_store %arg9[%c3_183, %c1_184, %c0_185, %c0_186], %237 {strides = array<i32>} : memref<4x4x8x128xbf16, #tpu.memory_space<vmem>>, vector<1x1x8x128xbf16>,
    %238 = vector.extract_strided_slice %10 {offsets = [8, 384], sizes = [8, 128], strides = [1, 1]} : vector<32x512xf32> to vector<8x128xf32>
    %239 = arith.truncf %238 : vector<8x128xf32> to vector<8x128xbf16>
    %c3_187 = arith.constant 3 : index
    %c1_188 = arith.constant 1 : index
    %c0_189 = arith.constant 0 : index
    %c0_190 = arith.constant 0 : index
    %240 = vector.load %arg10[%c3_187, %c1_188, %c0_189, %c0_190] : memref<4x4x8x128xbf16, #tpu.memory_space<vmem>>, vector<1x1x8x128xbf16>
    %241 = vector.shape_cast %240 : vector<1x1x8x128xbf16> to vector<8x128xbf16>
    %242 = vector.shape_cast %239 : vector<8x128xbf16> to vector<1x1x8x128xbf16>
    tpu.vector_store %arg10[%c3_187, %c1_188, %c0_189, %c0_190], %242 {strides = array<i32>} : memref<4x4x8x128xbf16, #tpu.memory_space<vmem>>, vector<1x1x8x128xbf16>,
    %243 = vector.extract_strided_slice %12 {offsets = [8, 384], sizes = [8, 128], strides = [1, 1]} : vector<32x512xf32> to vector<8x128xf32>
    %244 = arith.truncf %243 : vector<8x128xf32> to vector<8x128xbf16>
    %c3_191 = arith.constant 3 : index
    %c1_192 = arith.constant 1 : index
    %c0_193 = arith.constant 0 : index
    %c0_194 = arith.constant 0 : index
    %245 = vector.load %arg11[%c3_191, %c1_192, %c0_193, %c0_194] : memref<4x4x8x128xbf16, #tpu.memory_space<vmem>>, vector<1x1x8x128xbf16>
    %246 = vector.shape_cast %245 : vector<1x1x8x128xbf16> to vector<8x128xbf16>
    %247 = vector.shape_cast %244 : vector<8x128xbf16> to vector<1x1x8x128xbf16>
    tpu.vector_store %arg11[%c3_191, %c1_192, %c0_193, %c0_194], %247 {strides = array<i32>} : memref<4x4x8x128xbf16, #tpu.memory_space<vmem>>, vector<1x1x8x128xbf16>,
    %248 = vector.extract_strided_slice %5 {offsets = [16, 384], sizes = [8, 128], strides = [1, 1]} : vector<32x512xf32> to vector<8x128xf32>
    %249 = arith.truncf %248 : vector<8x128xf32> to vector<8x128xbf16>
    %c3_195 = arith.constant 3 : index
    %c2_196 = arith.constant 2 : index
    %c0_197 = arith.constant 0 : index
    %c0_198 = arith.constant 0 : index
    %250 = vector.load %arg9[%c3_195, %c2_196, %c0_197, %c0_198] : memref<4x4x8x128xbf16, #tpu.memory_space<vmem>>, vector<1x1x8x128xbf16>
    %251 = vector.shape_cast %250 : vector<1x1x8x128xbf16> to vector<8x128xbf16>
    %252 = vector.shape_cast %249 : vector<8x128xbf16> to vector<1x1x8x128xbf16>
    tpu.vector_store %arg9[%c3_195, %c2_196, %c0_197, %c0_198], %252 {strides = array<i32>} : memref<4x4x8x128xbf16, #tpu.memory_space<vmem>>, vector<1x1x8x128xbf16>,
    %253 = vector.extract_strided_slice %10 {offsets = [16, 384], sizes = [8, 128], strides = [1, 1]} : vector<32x512xf32> to vector<8x128xf32>
    %254 = arith.truncf %253 : vector<8x128xf32> to vector<8x128xbf16>
    %c3_199 = arith.constant 3 : index
    %c2_200 = arith.constant 2 : index
    %c0_201 = arith.constant 0 : index
    %c0_202 = arith.constant 0 : index
    %255 = vector.load %arg10[%c3_199, %c2_200, %c0_201, %c0_202] : memref<4x4x8x128xbf16, #tpu.memory_space<vmem>>, vector<1x1x8x128xbf16>
    %256 = vector.shape_cast %255 : vector<1x1x8x128xbf16> to vector<8x128xbf16>
    %257 = vector.shape_cast %254 : vector<8x128xbf16> to vector<1x1x8x128xbf16>
    tpu.vector_store %arg10[%c3_199, %c2_200, %c0_201, %c0_202], %257 {strides = array<i32>} : memref<4x4x8x128xbf16, #tpu.memory_space<vmem>>, vector<1x1x8x128xbf16>,
    %258 = vector.extract_strided_slice %12 {offsets = [16, 384], sizes = [8, 128], strides = [1, 1]} : vector<32x512xf32> to vector<8x128xf32>
    %259 = arith.truncf %258 : vector<8x128xf32> to vector<8x128xbf16>
    %c3_203 = arith.constant 3 : index
    %c2_204 = arith.constant 2 : index
    %c0_205 = arith.constant 0 : index
    %c0_206 = arith.constant 0 : index
    %260 = vector.load %arg11[%c3_203, %c2_204, %c0_205, %c0_206] : memref<4x4x8x128xbf16, #tpu.memory_space<vmem>>, vector<1x1x8x128xbf16>
    %261 = vector.shape_cast %260 : vector<1x1x8x128xbf16> to vector<8x128xbf16>
    %262 = vector.shape_cast %259 : vector<8x128xbf16> to vector<1x1x8x128xbf16>
    tpu.vector_store %arg11[%c3_203, %c2_204, %c0_205, %c0_206], %262 {strides = array<i32>} : memref<4x4x8x128xbf16, #tpu.memory_space<vmem>>, vector<1x1x8x128xbf16>,
    %263 = vector.extract_strided_slice %5 {offsets = [24, 384], sizes = [8, 128], strides = [1, 1]} : vector<32x512xf32> to vector<8x128xf32>
    %264 = arith.truncf %263 : vector<8x128xf32> to vector<8x128xbf16>
    %c3_207 = arith.constant 3 : index
    %c3_208 = arith.constant 3 : index
    %c0_209 = arith.constant 0 : index
    %c0_210 = arith.constant 0 : index
    %265 = vector.load %arg9[%c3_207, %c3_208, %c0_209, %c0_210] : memref<4x4x8x128xbf16, #tpu.memory_space<vmem>>, vector<1x1x8x128xbf16>
    %266 = vector.shape_cast %265 : vector<1x1x8x128xbf16> to vector<8x128xbf16>
    %267 = vector.shape_cast %264 : vector<8x128xbf16> to vector<1x1x8x128xbf16>
    tpu.vector_store %arg9[%c3_207, %c3_208, %c0_209, %c0_210], %267 {strides = array<i32>} : memref<4x4x8x128xbf16, #tpu.memory_space<vmem>>, vector<1x1x8x128xbf16>,
    %268 = vector.extract_strided_slice %10 {offsets = [24, 384], sizes = [8, 128], strides = [1, 1]} : vector<32x512xf32> to vector<8x128xf32>
    %269 = arith.truncf %268 : vector<8x128xf32> to vector<8x128xbf16>
    %c3_211 = arith.constant 3 : index
    %c3_212 = arith.constant 3 : index
    %c0_213 = arith.constant 0 : index
    %c0_214 = arith.constant 0 : index
    %270 = vector.load %arg10[%c3_211, %c3_212, %c0_213, %c0_214] : memref<4x4x8x128xbf16, #tpu.memory_space<vmem>>, vector<1x1x8x128xbf16>
    %271 = vector.shape_cast %270 : vector<1x1x8x128xbf16> to vector<8x128xbf16>
    %272 = vector.shape_cast %269 : vector<8x128xbf16> to vector<1x1x8x128xbf16>
    tpu.vector_store %arg10[%c3_211, %c3_212, %c0_213, %c0_214], %272 {strides = array<i32>} : memref<4x4x8x128xbf16, #tpu.memory_space<vmem>>, vector<1x1x8x128xbf16>,
    %273 = vector.extract_strided_slice %12 {offsets = [24, 384], sizes = [8, 128], strides = [1, 1]} : vector<32x512xf32> to vector<8x128xf32>
    %274 = arith.truncf %273 : vector<8x128xf32> to vector<8x128xbf16>
    %c3_215 = arith.constant 3 : index
    %c3_216 = arith.constant 3 : index
    %c0_217 = arith.constant 0 : index
    %c0_218 = arith.constant 0 : index
    %275 = vector.load %arg11[%c3_215, %c3_216, %c0_217, %c0_218] : memref<4x4x8x128xbf16, #tpu.memory_space<vmem>>, vector<1x1x8x128xbf16>
    %276 = vector.shape_cast %275 : vector<1x1x8x128xbf16> to vector<8x128xbf16>
    %277 = vector.shape_cast %274 : vector<8x128xbf16> to vector<1x1x8x128xbf16>
    tpu.vector_store %arg11[%c3_215, %c3_216, %c0_217, %c0_218], %277 {strides = array<i32>} : memref<4x4x8x128xbf16, #tpu.memory_space<vmem>>, vector<1x1x8x128xbf16>,
    return
  }
  func.func @transform_0(%arg0: i32) -> (i32, i32) {
    %c0_i32 = arith.constant 0 : i32
    %c0_i32_0 = arith.constant 0 : i32
    %c0_i32_1 = arith.constant 0 : i32
    return %c0_i32, %c0_i32_0 : i32, i32
  }
  func.func @transform_1(%arg0: i32) -> (i32, i32) {
    %c0_i32 = arith.constant 0 : i32
    %c0_i32_0 = arith.constant 0 : i32
    %c0_i32_1 = arith.constant 0 : i32
    return %c0_i32, %c0_i32_0 : i32, i32
  }
  func.func @transform_2(%arg0: i32) -> (i32, i32) {
    %c0_i32 = arith.constant 0 : i32
    %c0_i32_0 = arith.constant 0 : i32
    %c0_i32_1 = arith.constant 0 : i32
    return %c0_i32, %c0_i32_0 : i32, i32
  }
  func.func @transform_3(%arg0: i32) -> (i32, i32) {
    %c0_i32 = arith.constant 0 : i32
    %c0_i32_0 = arith.constant 0 : i32
    %c0_i32_1 = arith.constant 0 : i32
    return %c0_i32, %c0_i32_0 : i32, i32
  }
  func.func @transform_4(%arg0: i32) -> (i32, i32) {
    %c0_i32 = arith.constant 0 : i32
    %c0_i32_0 = arith.constant 0 : i32
    %c0_i32_1 = arith.constant 0 : i32
    return %c0_i32, %c0_i32_0 : i32, i32
  }
  func.func @transform_5(%arg0: i32) -> (i32, i32) {
    %c0_i32 = arith.constant 0 : i32
    %c0_i32_0 = arith.constant 0 : i32
    %c0_i32_1 = arith.constant 0 : i32
    return %c0_i32, %c0_i32_0 : i32, i32
  }
  func.func @transform_6(%arg0: i32) -> (i32, i32) {
    %c0_i32 = arith.constant 0 : i32
    %c0_i32_0 = arith.constant 0 : i32
    %c0_i32_1 = arith.constant 0 : i32
    return %c0_i32, %c0_i32_0 : i32, i32
  }
  func.func @transform_7(%arg0: i32) -> (i32, i32) {
    %c0_i32 = arith.constant 0 : i32
    %c0_i32_0 = arith.constant 0 : i32
    %c0_i32_1 = arith.constant 0 : i32
    return %c0_i32, %c0_i32_0 : i32, i32
  }
  func.func @transform_8(%arg0: i32) -> (i32, i32, i32, i32) {
    %c0_i32 = arith.constant 0 : i32
    %c0_i32_0 = arith.constant 0 : i32
    %c0_i32_1 = arith.constant 0 : i32
    %c0_i32_2 = arith.constant 0 : i32
    %c0_i32_3 = arith.constant 0 : i32
    return %c0_i32, %c0_i32_0, %c0_i32_1, %c0_i32_2 : i32, i32, i32, i32
  }
  func.func @transform_9(%arg0: i32) -> (i32, i32, i32, i32) {
    %c0_i32 = arith.constant 0 : i32
    %c0_i32_0 = arith.constant 0 : i32
    %c0_i32_1 = arith.constant 0 : i32
    %c0_i32_2 = arith.constant 0 : i32
    %c0_i32_3 = arith.constant 0 : i32
    return %c0_i32, %c0_i32_0, %c0_i32_1, %c0_i32_2 : i32, i32, i32, i32
  }
  func.func @transform_10(%arg0: i32) -> (i32, i32, i32, i32) {
    %c0_i32 = arith.constant 0 : i32
    %c0_i32_0 = arith.constant 0 : i32
    %c0_i32_1 = arith.constant 0 : i32
    %c0_i32_2 = arith.constant 0 : i32
    %c0_i32_3 = arith.constant 0 : i32
    return %c0_i32, %c0_i32_0, %c0_i32_1, %c0_i32_2 : i32, i32, i32, i32
  }
  func.func @transform_11(%arg0: i32) -> (i32, i32, i32) {
    %c0_i32 = arith.constant 0 : i32
    %c0_i32_0 = arith.constant 0 : i32
    %c0_i32_1 = arith.constant 0 : i32
    %c0_i32_2 = arith.constant 0 : i32
    return %c0_i32, %c0_i32_0, %c0_i32_1 : i32, i32, i32
  }
}

</mosaic_0001>

<bundles_post_ra>
// kernel: tpu_custom_call.1
= control target key start
LH: loop header
LB: loop body
LE: loop exit
PB: predicated region body
PF: predicated region fallthrough
CT: control target
= control target key end

     0   :  { %17 = vsyncpa [#allocation3], 0  ;;  %s1731_s0 = inlined_call_operand.vmem [shape: bf16[32,512], index: 0, kind: input, shape index: {}]   ;;  %s1732_s1 = inlined_call_operand.vmem [shape: bf16[32,32], index: 1, kind: input, shape index: {}]   ;;  %s1733_s2 = inlined_call_operand.vmem [shape: f32[32,1], index: 2, kind: input, shape index: {}]   ;;  %s1734_s3 = inlined_call_operand.vmem [shape: bf16[32,32], index: 3, kind: input, shape index: {}]   ;;  %s1735_s4 = inlined_call_operand.vmem [shape: f32[32,1], index: 4, kind: input, shape index: {}]   ;;  %s1736_s5 = inlined_call_operand.vmem [shape: bf16[32,32], index: 5, kind: input, shape index: {}]   ;;  %s1737_s6 = inlined_call_operand.vmem [shape: bf16[64,32], index: 6, kind: input, shape index: {}]   ;;  %s1738_s7 = inlined_call_operand.vmem [shape: f32[64,1], index: 7, kind: input, shape index: {}]   ;;  %s1739_s8 = inlined_call_operand.hbm [shape: bf16[4,4,8,128], index: 8, kind: output, shape index: {0}]   ;;  %s1740_s9 = inlined_call_operand.hbm [shape: bf16[4,4,8,128], index: 9, kind: output, shape index: {1}]   ;;  %s1741_s10 = inlined_call_operand.hbm [shape: bf16[4,4,8,128], index: 10, kind: output, shape index: {2}]   ;;  %s1742_s11 = inlined_call_operand.hbm [shape: bf16[4,64,128], index: 11, kind: output, shape index: {3}]  }
   0x1   :  { %18 = vsyncpa [#allocation5], 0  ;;  %v1494_v0 = vld [vmem:[%s1731_s0 + $0x24] ss:$16 sps:$4 sm:$0xff]   ;;  %v1499_v1 = vld [vmem:[%s1731_s0 + $0x2c] ss:$16 sps:$4 sm:$0xff]  }
   0x2   :  { %v1424_v2 = vmov 0   ;;  %142 = vmatprep.subr.bf16.mxu0 %v1494_v0  ;;  %v1507_v3 = vld [vmem:[%s1731_s0 + $0x20] ss:$16 sps:$4 sm:$0xff]   ;;  %v1512_v4 = vld [vmem:[%s1731_s0 + $0x28] ss:$16 sps:$4 sm:$0xff]   ;;  %195 = vmatprep.subr.bf16.mxu1 %v1499_v1  ;;  %vm123_vm0 = vcmask 261120  }
   0x3   :  { %162 = vmatprep.mubr.bf16.mxu0 %v1424_v2  ;;  %215 = vmatprep.mubr.bf16.mxu1 %v1424_v2  ;;  %v1519_v5 = vld [vmem:[%s1731_s0 + $0x4] ss:$16 sps:$4 sm:$0xff]   ;;  %v1527_v6 = vld [vmem:[%s1731_s0 + $0xc] ss:$16 sps:$4 sm:$0xff]   ;;  %v1532_v7 = vld [vmem:[%s1731_s0] ss:$16 sps:$4 sm:$0xff]  }
   0x4   :  { %1314 = vset.pattern.permute.xlu0 %v1424_v2  ;;  %1315 = vset.pattern.permute.xlu1 %v1424_v2  ;;  %v1538_v8 = vld [vmem:[%s1731_s0 + $0x8] ss:$16 sps:$4 sm:$0xff]   ;;  %v1328_v9 = vld [vmem:[%s1732_s1] sm:$0xff]   ;;  %v242_v11 = vld [vmem:[%s1735_s4 + $0x10] sm:$0xff] }
   0x5   :  { %143 = vmatpush1.bf16.msra.mxu0 %v1507_v3  ;;  %196 = vmatpush1.bf16.msra.mxu1 %v1512_v4  ;;  %v240_v10 = vld [vmem:[%s1735_s4] sm:$0xff]  ;;  %v1329_v12 = vld [vmem:[%s1732_s1 + $0x8] sm:$0xff]   ;;  %v243_v14 = vld [vmem:[%s1735_s4 + $0x18] sm:$0xff] }
   0x6   :  { %144 = vmatprep.subr.bf16.mxu0 %v1519_v5  ;;  %197 = vmatprep.subr.bf16.mxu1 %v1527_v6  ;;  %v241_v13 = vld [vmem:[%s1735_s4 + $0x8] sm:$0xff] }
   0x7   :  { %246 = vperm.xlu0 %1314, %v240_v10   ;;  %256 = vperm.xlu1 %1315, %v242_v11  }
   0x9   :  { %145 = vmatpush1.bf16.msra.mxu0 %v1532_v7  ;;  %198 = vmatpush1.bf16.msra.mxu1 %v1538_v8 }
   0xa   :  { %292 = vmatprep.subr.bf16.mxu0 %v1494_v0  ;;  %345 = vmatprep.subr.bf16.mxu1 %v1499_v1 }
   0xc   :  { %1123 = vmatmul.mubr.msk.bf16.vlgmr.msra.gmra.mxu0 %vm123_vm0, %v1328_v9  ;;  %1125 = vmatmul.mubr.msk.bf16.vlgmr.msra.gmra.mxu1 %vm123_vm0, %v1328_v9 }
   0xd   :  { %293 = vmatpush1.bf16.msra.mxu0 %v1507_v3  ;;  %346 = vmatpush1.bf16.msra.mxu1 %v1512_v4 }
   0xe   :  { %172 = vmatprep.mubr.bf16.mxu0 %v1424_v2  ;;  %225 = vmatprep.mubr.bf16.mxu1 %v1424_v2 }
   0xf   :  { %294 = vmatprep.subr.bf16.mxu0 %v1519_v5  ;;  %347 = vmatprep.subr.bf16.mxu1 %v1527_v6 }
  0x11   :  { %295 = vmatpush1.bf16.msra.mxu0 %v1532_v7  ;;  %348 = vmatpush1.bf16.msra.mxu1 %v1538_v8 }
  0x12   :  { %418 = vmatprep.subr.bf16.mxu0 %v1494_v0  ;;  %471 = vmatprep.subr.bf16.mxu1 %v1499_v1 }
  0x14   :  { %1124 = vmatmul.mubr.msk.bf16.gmra.mxu0 %vm123_vm0, %v1329_v12  ;;  %1126 = vmatmul.mubr.msk.bf16.gmra.mxu1 %vm123_vm0, %v1329_v12 }
  0x15   :  { %312 = vmatprep.mubr.bf16.mxu0 %v1424_v2  ;;  %365 = vmatprep.mubr.bf16.mxu1 %v1424_v2 }
  0x16   :  { %19 = vsyncpa [#allocation8], 0  ;;  %251 = vperm.xlu0 %1314, %v241_v13   ;;  %261 = vperm.xlu1 %1315, %v243_v14   ;;  %v49_v15 = vld [vmem:[%s1733_s2] sm:$0xff]  ;;  %v50_v16 = vld [vmem:[%s1733_s2 + $0x8] sm:$0xff] }
  0x17   :  { %v1330_v17 = vld [vmem:[%s1734_s3] sm:$0xff]   ;;  %v51_v18 = vld [vmem:[%s1733_s2 + $0x10] sm:$0xff]  ;;  %v52_v19 = vld [vmem:[%s1733_s2 + $0x18] sm:$0xff] }
  0x18   :  { %v1331_v20 = vld [vmem:[%s1734_s3 + $0x8] sm:$0xff]   ;;  %v520_v22 = vld [vmem:[%s1738_s7] sm:$0xff]  ;;  %v523_v23 = vld [vmem:[%s1738_s7 + $0x18] sm:$0xff] }
  0x19   :  { %v521_v21 = vld [vmem:[%s1738_s7 + $0x8] sm:$0xff]  ;;  %v522_v24 = vld [vmem:[%s1738_s7 + $0x10] sm:$0xff]  ;;  %v1332_v25 = vld [vmem:[%s1736_s5] sm:$0xff]  }
  0x1a   :  { %55 = vperm.xlu0 %1314, %v49_v15   ;;  %60 = vperm.xlu1 %1315, %v50_v16   ;;  %v525_v26 = vld [vmem:[%s1738_s7 + $0x28] sm:$0xff]  ;;  %v524_v27 = vld [vmem:[%s1738_s7 + $0x20] sm:$0xff]  ;;  %v527_v29 = vld [vmem:[%s1738_s7 + $0x38] sm:$0xff] }
  0x1b   :  { %v1333_v28 = vld [vmem:[%s1736_s5 + $0x8] sm:$0xff]   ;;  %v526_v30 = vld [vmem:[%s1738_s7 + $0x30] sm:$0xff]  ;;  %v1334_v31 = vld [vmem:[%s1737_s6] sm:$0xff]  }
  0x1c   :  { %1129 = vmatmul.mubr.msk.bf16.vlgmr.msra.gmra.mxu0 %vm123_vm0, %v1330_v17  ;;  %1131 = vmatmul.mubr.msk.bf16.vlgmr.msra.gmra.mxu1 %vm123_vm0, %v1330_v17  ;;  %v1335_v32 = vld [vmem:[%s1737_s6 + $0x8] sm:$0xff]   ;;  %v1336_v33 = vld [vmem:[%s1737_s6 + $0x10] sm:$0xff]   ;;  %v1337_v34 = vld [vmem:[%s1737_s6 + $0x18] sm:$0xff]   ;;  %s1425_s6 = smov [#allocation2]  }
  0x1d   :  { %419 = vmatpush1.bf16.msra.mxu0 %v1507_v3  ;;  %472 = vmatpush1.bf16.msra.mxu1 %v1512_v4  ;;  %s1055_s16 = sshll.u32 %s1425_s6, 4  ;;  %s1056_s16 = int_to_ptr.vmem [resolvable:$true] %s1055_s16 }
  0x1e   :  { %322 = vmatprep.mubr.bf16.mxu0 %v1424_v2  ;;  %375 = vmatprep.mubr.bf16.mxu1 %v1424_v2  ;;  %s1338_s17 = scalar_lea.vmem %s1056_s16, 1024  ;;  %p1343_p1 = scmp.lt.s32.totalorder %s1056_s16, %s1056_s16 }
  0x1f   :  { %420 = vmatprep.subr.bf16.mxu0 %v1519_v5  ;;  %473 = vmatprep.subr.bf16.mxu1 %v1527_v6  ;;  %p1339_p0 = scmp.ne.s32.totalorder %s1056_s16, %s1338_s17  ;;  %p1344_p2 = scmp.lt.s32.totalorder %s1338_s17, %s1338_s17 }
  0x20   :  { %65 = vperm.xlu0 %1314, %v51_v18   ;;  %70 = vperm.xlu1 %1315, %v52_v19  }
  0x21   :  { %421 = vmatpush1.bf16.msra.mxu0 %v1532_v7  ;;  %474 = vmatpush1.bf16.msra.mxu1 %v1538_v8  ;;  %p1345_p3 = por %p1344_p2, %p1343_p1 }
  0x22   :  { %612 = vmatprep.subr.bf16.mxu0 %v1494_v0  ;;  %685 = vmatprep.subr.bf16.mxu1 %v1499_v1 }
  0x23   :  { %p1346_p4 = pnand %p1345_p3, %p1339_p0 }
  0x24   :  { %1130 = vmatmul.mubr.msk.bf16.gmra.mxu0 %vm123_vm0, %v1331_v20  ;;  %1132 = vmatmul.mubr.msk.bf16.gmra.mxu1 %vm123_vm0, %v1331_v20 }
  0x25   :  { %438 = vmatprep.mubr.bf16.mxu0 %v1424_v2  ;;  %491 = vmatprep.mubr.bf16.mxu1 %v1424_v2 }
  0x26   :  { %535 = vperm.xlu1 %1315, %v521_v21   ;;  %530 = vperm.xlu0 %1314, %v520_v22  }
  0x2a   :  { %545 = vperm.xlu1 %1315, %v523_v23   ;;  %540 = vperm.xlu0 %1314, %v522_v24  }
  0x2c   :  { %1135 = vmatmul.mubr.msk.bf16.vlgmr.msra.gmra.mxu0 %vm123_vm0, %v1332_v25  ;;  %1137 = vmatmul.mubr.msk.bf16.vlgmr.msra.gmra.mxu1 %vm123_vm0, %v1332_v25 }
  0x2d   :  { %613 = vmatpush1.bf16.msra.mxu0 %v1507_v3  ;;  %686 = vmatpush1.bf16.msra.mxu1 %v1512_v4 }
  0x2e   :  { %448 = vmatprep.mubr.bf16.mxu0 %v1424_v2  ;;  %501 = vmatprep.mubr.bf16.mxu1 %v1424_v2 }
  0x2f   :  { %614 = vmatprep.subr.bf16.mxu0 %v1519_v5  ;;  %687 = vmatprep.subr.bf16.mxu1 %v1527_v6 }
  0x30   :  { %555 = vperm.xlu1 %1315, %v525_v26   ;;  %550 = vperm.xlu0 %1314, %v524_v27  }
  0x31   :  { %615 = vmatpush1.bf16.msra.mxu0 %v1532_v7  ;;  %688 = vmatpush1.bf16.msra.mxu1 %v1538_v8 }
  0x34   :  { %1136 = vmatmul.mubr.msk.bf16.gmra.mxu0 %vm123_vm0, %v1333_v28  ;;  %1138 = vmatmul.mubr.msk.bf16.gmra.mxu1 %vm123_vm0, %v1333_v28 }
  0x35   :  { %632 = vmatprep.mubr.bf16.mxu0 %v1424_v2  ;;  %705 = vmatprep.mubr.bf16.mxu1 %v1424_v2 }
  0x36   :  { %565 = vperm.xlu1 %1315, %v527_v29   ;;  %560 = vperm.xlu0 %1314, %v526_v30  }
  0x3c   :  { %1143 = vmatmul.mubr.msk.bf16.vlgmr.msra.gmra.mxu0 %vm123_vm0, %v1334_v31  ;;  %1147 = vmatmul.mubr.msk.bf16.vlgmr.msra.gmra.mxu1 %vm123_vm0, %v1334_v31 }
  0x3d   :  { %642 = vmatprep.mubr.bf16.mxu0 %v1424_v2  ;;  %715 = vmatprep.mubr.bf16.mxu1 %v1424_v2 }
  0x44   :  { %1144 = vmatmul.mubr.msk.bf16.gmra.mxu0 %vm123_vm0, %v1335_v32  ;;  %1148 = vmatmul.mubr.msk.bf16.gmra.mxu1 %vm123_vm0, %v1335_v32 }
  0x45   :  { %652 = vmatprep.mubr.bf16.mxu0 %v1424_v2  ;;  %725 = vmatprep.mubr.bf16.mxu1 %v1424_v2 }
  0x4c   :  { %1145 = vmatmul.mubr.msk.bf16.gmra.mxu0 %vm123_vm0, %v1336_v33  ;;  %1149 = vmatmul.mubr.msk.bf16.gmra.mxu1 %vm123_vm0, %v1336_v33 }
  0x4d   :  { %662 = vmatprep.mubr.bf16.mxu0 %v1424_v2  ;;  %735 = vmatprep.mubr.bf16.mxu1 %v1424_v2 }
  0x54   :  { %1146 = vmatmul.mubr.msk.bf16.gmra.mxu0 %vm123_vm0, %v1337_v34  ;;  %1150 = vmatmul.mubr.msk.bf16.gmra.mxu1 %vm123_vm0, %v1337_v34 }
  0x82   :  { %v1683_v35 = vpop.permute.xlu0 %246  ;;  %v1685_v36 = vpop.permute.xlu1 %256 }
  0x91   :  { %v1687_v37 = vpop.permute.xlu0 %251  ;;  %v1689_v38 = vpop.permute.xlu1 %261 }
  0x95   :  { %v56_v39 = vpop.permute.xlu0 %55  ;;  %v61_v44 = vpop.permute.xlu1 %60 }
  0x9b   :  { %v66_v57 = vpop.permute.xlu0 %65  ;;  %v71_v6 = vpop.permute.xlu1 %70 }
  0xcc   :  { %v164_v40 = vpop.f32.mrf.mxu0  ;;  %v217_v41 = vpop.f32.mrf.mxu1 }
  0xcd   :  { %v165_v42 = vadd.f32 %v164_v40, %v56_v39  ;;  %v218_v43 = vadd.f32 %v217_v41, %v56_v39 }
  0xce   :  { %v166_v45 = vpop.f32.mrf.mxu0  ;;  %v219_v46 = vpop.f32.mrf.mxu1 }
  0xcf   :  { %v786_v47 = vpack.c.bf16 %v165_v42, %v165_v42  ;;  %v937_v48 = vpack.c.bf16 %v218_v43, %v218_v43  ;;  %v167_v49 = vadd.f32 %v166_v45, %v56_v39  ;;  %v220_v50 = vadd.f32 %v219_v46, %v56_v39 }
  0xd0   :  { %v168_v51 = vpop.f32.mrf.mxu0  ;;  %v221_v52 = vpop.f32.mrf.mxu1 }
  0xd1   :  { %787 = vst [vmem:[#allocation2] sm:$0xf] %v786_v47  ;;  %939 = vst [vmem:[#allocation2 + $0x20] sm:$0xf] %v937_v48  ;;  %v860_v53 = vpack.c.bf16 %v167_v49, %v167_v49  ;;  %v1014_v54 = vpack.c.bf16 %v220_v50, %v220_v50  ;;  %v169_v55 = vadd.f32 %v168_v51, %v61_v44 }
  0xd2   :  { %v222_v56 = vadd.f32 %v221_v52, %v61_v44  ;;  %v170_v58 = vpop.f32.mrf.mxu0  ;;  %v223_v59 = vpop.f32.mrf.mxu1 }
  0xd3   :  { %862 = vst [vmem:[#allocation2 + $0x10] sm:$0xf] %v860_v53  ;;  %1016 = vst [vmem:[#allocation2 + $0x30] sm:$0xf] %v1014_v54  ;;  %v792_v60 = vpack.c.bf16 %v169_v55, %v169_v55  ;;  %v171_v62 = vadd.f32 %v170_v58, %v61_v44  ;;  %v224_v63 = vadd.f32 %v223_v59, %v61_v44 }
  0xd4   :  { %v946_v61 = vpack.c.bf16 %v222_v56, %v222_v56  ;;  %v174_v0 = vpop.f32.mrf.mxu0  ;;  %v227_v1 = vpop.f32.mrf.mxu1 }
  0xd5   :  { %794 = vst [vmem:[#allocation2 + $0x4] sm:$0xf] %v792_v60  ;;  %v869_v2 = vpack.c.bf16 %v171_v62, %v171_v62  ;;  %v1023_v3 = vpack.c.bf16 %v224_v63, %v224_v63  ;;  %v175_v4 = vadd.f32 %v174_v0, %v66_v57  ;;  %v228_v5 = vadd.f32 %v227_v1, %v66_v57 }
  0xd6   :  { %948 = vst [vmem:[#allocation2 + $0x24] sm:$0xf] %v946_v61  ;;  %v176_v7 = vpop.f32.mrf.mxu0  ;;  %v229_v8 = vpop.f32.mrf.mxu1 }
  0xd7   :  { %871 = vst [vmem:[#allocation2 + $0x14] sm:$0xf] %v869_v2  ;;  %1025 = vst [vmem:[#allocation2 + $0x34] sm:$0xf] %v1023_v3  ;;  %v801_v9 = vpack.c.bf16 %v175_v4, %v175_v4  ;;  %v955_v10 = vpack.c.bf16 %v228_v5, %v228_v5  ;;  %v177_v11 = vadd.f32 %v176_v7, %v66_v57 }
  0xd8   :  { %v230_v12 = vadd.f32 %v229_v8, %v66_v57  ;;  %v178_v13 = vpop.f32.mrf.mxu0  ;;  %v231_v14 = vpop.f32.mrf.mxu1 }
  0xd9   :  { %803 = vst [vmem:[#allocation2 + $0x8] sm:$0xf] %v801_v9  ;;  %957 = vst [vmem:[#allocation2 + $0x28] sm:$0xf] %v955_v10  ;;  %v878_v15 = vpack.c.bf16 %v177_v11, %v177_v11  ;;  %v179_v17 = vadd.f32 %v178_v13, %v71_v6  ;;  %v232_v18 = vadd.f32 %v231_v14, %v71_v6 }
  0xda   :  { %v1032_v16 = vpack.c.bf16 %v230_v12, %v230_v12  ;;  %v180_v19 = vpop.f32.mrf.mxu0  ;;  %v233_v20 = vpop.f32.mrf.mxu1 }
  0xdb   :  { %880 = vst [vmem:[#allocation2 + $0x18] sm:$0xf] %v878_v15  ;;  %v810_v21 = vpack.c.bf16 %v179_v17, %v179_v17  ;;  %v964_v22 = vpack.c.bf16 %v232_v18, %v232_v18  ;;  %v181_v23 = vadd.f32 %v180_v19, %v71_v6  ;;  %v234_v24 = vadd.f32 %v233_v20, %v71_v6 }
  0xdc   :  { %1034 = vst [vmem:[#allocation2 + $0x38] sm:$0xf] %v1032_v16  ;;  %v314_v25 = vpop.f32.mrf.mxu0  ;;  %v367_v26 = vpop.f32.mrf.mxu1 }
  0xdd   :  { %812 = vst [vmem:[#allocation2 + $0xc] sm:$0xf] %v810_v21  ;;  %966 = vst [vmem:[#allocation2 + $0x2c] sm:$0xf] %v964_v22  ;;  %v887_v27 = vpack.c.bf16 %v181_v23, %v181_v23  ;;  %v1041_v28 = vpack.c.bf16 %v234_v24, %v234_v24  ;;  %v315_v29 = vadd.f32 %v314_v25, %v1683_v35 }
  0xde   :  { %v368_v30 = vadd.f32 %v367_v26, %v1683_v35  ;;  %v316_v31 = vpop.f32.mrf.mxu0  ;;  %v369_v32 = vpop.f32.mrf.mxu1 }
  0xdf   :  { %889 = vst [vmem:[#allocation2 + $0x1c] sm:$0xf] %v887_v27  ;;  %1043 = vst [vmem:[#allocation2 + $0x3c] sm:$0xf] %v1041_v28  ;;  %v788_v33 = vpack.c.bf16 %v315_v29, %v315_v29  ;;  %v317_v39 = vadd.f32 %v316_v31, %v1683_v35  ;;  %v370_v40 = vadd.f32 %v369_v32, %v1683_v35 }
  0xe0   :  { %v940_v34 = vpack.c.bf16 %v368_v30, %v368_v30  ;;  %v318_v41 = vpop.f32.mrf.mxu0  ;;  %v371_v42 = vpop.f32.mrf.mxu1 }
  0xe1   :  { %1349 = shalt.err (!%p1346_p4)
}
  0xe2   :  { %s1426_s3 = smov 64   ;;  %s1427_s18 = smov 4   ;;  %789 = vst [vmem:[#allocation4] sm:$0xf] %v788_v33  ;;  %942 = vst [vmem:[#allocation4 + $0x20] sm:$0xf] %v940_v34  ;;  %v863_v35 = vpack.c.bf16 %v317_v39, %v317_v39  ;;  %v1017_v43 = vpack.c.bf16 %v370_v40, %v370_v40  ;;  %v319_v44 = vadd.f32 %v318_v41, %v1687_v37  ;;  %v320_v46 = vpop.f32.mrf.mxu0  ;;  %v373_v47 = vpop.f32.mrf.mxu1 }
  0xe3   :  { %1061 = dma.vmem_to_hbm [thread:$0]  %s1056_s16, 1024, %s1739_s8, [#allocation3], %s1426_s3, %s1426_s3, %s1427_s18   ;;  %v372_v45 = vadd.f32 %v371_v42, %v1687_v37  ;;  %v321_v50 = vadd.f32 %v320_v46, %v1687_v37  ;;  %v374_v51 = vadd.f32 %v373_v47, %v1687_v37 }
  0xe4   :  { %865 = vst [vmem:[#allocation4 + $0x10] sm:$0xf] %v863_v35  ;;  %1019 = vst [vmem:[#allocation4 + $0x30] sm:$0xf] %v1017_v43  ;;  %v795_v48 = vpack.c.bf16 %v319_v44, %v319_v44  ;;  %v324_v52 = vpop.f32.mrf.mxu0  ;;  %v377_v53 = vpop.f32.mrf.mxu1  ;;  %s1428_s8 = smov [#allocation4]  }
  0xe5   :  { %v949_v49 = vpack.c.bf16 %v372_v45, %v372_v45  ;;  %v872_v54 = vpack.c.bf16 %v321_v50, %v321_v50  ;;  %v1026_v55 = vpack.c.bf16 %v374_v51, %v374_v51  ;;  %v325_v56 = vadd.f32 %v324_v52, %v1685_v36  ;;  %s1067_s21 = sshll.u32 %s1428_s8, 4  ;;  %s1068_s21 = int_to_ptr.vmem [resolvable:$true] %s1067_s21 }
  0xe6   :  { %797 = vst [vmem:[#allocation4 + $0x4] sm:$0xf] %v795_v48  ;;  %v378_v57 = vadd.f32 %v377_v53, %v1685_v36  ;;  %v326_v58 = vpop.f32.mrf.mxu0  ;;  %v379_v59 = vpop.f32.mrf.mxu1  ;;  %s1358_s22 = scalar_lea.vmem %s1068_s21, 1024  ;;  %p1363_p6 = scmp.lt.s32.totalorder %s1068_s21, %s1068_s21 }
  0xe7   :  { %951 = vst [vmem:[#allocation4 + $0x24] sm:$0xf] %v949_v49  ;;  %874 = vst [vmem:[#allocation4 + $0x14] sm:$0xf] %v872_v54  ;;  %v804_v60 = vpack.c.bf16 %v325_v56, %v325_v56  ;;  %v327_v62 = vadd.f32 %v326_v58, %v1685_v36  ;;  %v380_v37 = vadd.f32 %v379_v59, %v1685_v36  ;;  %p1359_p5 = scmp.ne.s32.totalorder %s1068_s21, %s1358_s22  ;;  %p1364_p7 = scmp.lt.s32.totalorder %s1358_s22, %s1358_s22 }
  0xe8   :  { %1028 = vst [vmem:[#allocation4 + $0x34] sm:$0xf] %v1026_v55  ;;  %v958_v61 = vpack.c.bf16 %v378_v57, %v378_v57  ;;  %v328_v63 = vpop.f32.mrf.mxu0  ;;  %v381_v0 = vpop.f32.mrf.mxu1 }
  0xe9   :  { %806 = vst [vmem:[#allocation4 + $0x8] sm:$0xf] %v804_v60  ;;  %v881_v1 = vpack.c.bf16 %v327_v62, %v327_v62  ;;  %v1035_v2 = vpack.c.bf16 %v380_v37, %v380_v37  ;;  %v329_v3 = vadd.f32 %v328_v63, %v1689_v38  ;;  %v382_v4 = vadd.f32 %v381_v0, %v1689_v38  ;;  %p1365_p8 = por %p1364_p7, %p1363_p6 }
  0xea   :  { %960 = vst [vmem:[#allocation4 + $0x28] sm:$0xf] %v958_v61  ;;  %v330_v5 = vpop.f32.mrf.mxu0  ;;  %v383_v6 = vpop.f32.mrf.mxu1 }
  0xeb   :  { %883 = vst [vmem:[#allocation4 + $0x18] sm:$0xf] %v881_v1  ;;  %1037 = vst [vmem:[#allocation4 + $0x38] sm:$0xf] %v1035_v2  ;;  %v813_v7 = vpack.c.bf16 %v329_v3, %v329_v3  ;;  %v967_v8 = vpack.c.bf16 %v382_v4, %v382_v4  ;;  %v331_v36 = vadd.f32 %v330_v5, %v1689_v38  ;;  %p1366_p9 = pnand %p1365_p8, %p1359_p5 }
  0xec   :  { %v384_v9 = vadd.f32 %v383_v6, %v1689_v38  ;;  %v440_v10 = vpop.f32.mrf.mxu0  ;;  %v493_v11 = vpop.f32.mrf.mxu1 }
  0xed   :  { %815 = vst [vmem:[#allocation4 + $0xc] sm:$0xf] %v813_v7  ;;  %969 = vst [vmem:[#allocation4 + $0x2c] sm:$0xf] %v967_v8  ;;  %v890_v12 = vpack.c.bf16 %v331_v36, %v331_v36  ;;  %v790_v14 = vpack.c.bf16 %v440_v10, %v440_v10  ;;  %v943_v15 = vpack.c.bf16 %v493_v11, %v493_v11 }
  0xee   :  { %v1044_v13 = vpack.c.bf16 %v384_v9, %v384_v9  ;;  %v442_v16 = vpop.f32.mrf.mxu0  ;;  %v495_v17 = vpop.f32.mrf.mxu1 }
  0xef   :  { %892 = vst [vmem:[#allocation4 + $0x1c] sm:$0xf] %v890_v12  ;;  %791 = vst [vmem:[#allocation6] sm:$0xf] %v790_v14  ;;  %v866_v18 = vpack.c.bf16 %v442_v16, %v442_v16  ;;  %v1020_v19 = vpack.c.bf16 %v495_v17, %v495_v17 }
  0xf0   :  { %1046 = vst [vmem:[#allocation4 + $0x3c] sm:$0xf] %v1044_v13  ;;  %945 = vst [vmem:[#allocation6 + $0x20] sm:$0xf] %v943_v15  ;;  %v444_v20 = vpop.f32.mrf.mxu0  ;;  %v497_v21 = vpop.f32.mrf.mxu1 }
  0xf1   :  { %1369 = shalt.err (!%p1366_p9)
}
  0xf2   :  { %1073 = dma.vmem_to_hbm [thread:$0]  %s1068_s21, 1024, %s1740_s9, [#allocation5], %s1426_s3, %s1426_s3, %s1427_s18   ;;  %868 = vst [vmem:[#allocation6 + $0x10] sm:$0xf] %v866_v18  ;;  %1022 = vst [vmem:[#allocation6 + $0x30] sm:$0xf] %v1020_v19  ;;  %v798_v38 = vpack.c.bf16 %v444_v20, %v444_v20  ;;  %v952_v22 = vpack.c.bf16 %v497_v21, %v497_v21  ;;  %v446_v23 = vpop.f32.mrf.mxu0  ;;  %v499_v24 = vpop.f32.mrf.mxu1 }
  0xf3   :  { %v875_v25 = vpack.c.bf16 %v446_v23, %v446_v23  ;;  %v1029_v26 = vpack.c.bf16 %v499_v24, %v499_v24  ;;  %s1429_s9 = smov [#allocation6]  }
  0xf4   :  { %800 = vst [vmem:[#allocation6 + $0x4] sm:$0xf] %v798_v38  ;;  %954 = vst [vmem:[#allocation6 + $0x24] sm:$0xf] %v952_v22  ;;  %v450_v27 = vpop.f32.mrf.mxu0  ;;  %v503_v28 = vpop.f32.mrf.mxu1  ;;  %s1079_s1 = sshll.u32 %s1429_s9, 4  ;;  %s1080_s1 = int_to_ptr.vmem [resolvable:$true] %s1079_s1 }
  0xf5   :  { %877 = vst [vmem:[#allocation6 + $0x14] sm:$0xf] %v875_v25  ;;  %1031 = vst [vmem:[#allocation6 + $0x34] sm:$0xf] %v1029_v26  ;;  %v807_v29 = vpack.c.bf16 %v450_v27, %v450_v27  ;;  %v961_v30 = vpack.c.bf16 %v503_v28, %v503_v28  ;;  %s1378_s25 = scalar_lea.vmem %s1080_s1, 1024  ;;  %p1383_p11 = scmp.lt.s32.totalorder %s1080_s1, %s1080_s1 }
  0xf6   :  { %v452_v31 = vpop.f32.mrf.mxu0  ;;  %v505_v32 = vpop.f32.mrf.mxu1  ;;  %p1379_p10 = scmp.ne.s32.totalorder %s1080_s1, %s1378_s25  ;;  %p1384_p12 = scmp.lt.s32.totalorder %s1378_s25, %s1378_s25 }
  0xf7   :  { %809 = vst [vmem:[#allocation6 + $0x8] sm:$0xf] %v807_v29  ;;  %963 = vst [vmem:[#allocation6 + $0x28] sm:$0xf] %v961_v30  ;;  %v884_v33 = vpack.c.bf16 %v452_v31, %v452_v31  ;;  %v1038_v34 = vpack.c.bf16 %v505_v32, %v505_v32 }
  0xf8   :  { %v454_v39 = vpop.f32.mrf.mxu0  ;;  %v507_v40 = vpop.f32.mrf.mxu1  ;;  %p1385_p13 = por %p1384_p12, %p1383_p11 }
  0xf9   :  { %886 = vst [vmem:[#allocation6 + $0x18] sm:$0xf] %v884_v33  ;;  %1040 = vst [vmem:[#allocation6 + $0x38] sm:$0xf] %v1038_v34  ;;  %v816_v41 = vpack.c.bf16 %v454_v39, %v454_v39  ;;  %v970_v42 = vpack.c.bf16 %v507_v40, %v507_v40 }
  0xfa   :  { %v456_v35 = vpop.f32.mrf.mxu0  ;;  %v509_v43 = vpop.f32.mrf.mxu1  ;;  %p1386_p0 = pnand %p1385_p13, %p1379_p10 }
  0xfb   :  { %818 = vst [vmem:[#allocation6 + $0xc] sm:$0xf] %v816_v41  ;;  %972 = vst [vmem:[#allocation6 + $0x2c] sm:$0xf] %v970_v42  ;;  %v893_v44 = vpack.c.bf16 %v456_v35, %v456_v35  ;;  %v1047_v45 = vpack.c.bf16 %v509_v43, %v509_v43 }
  0xfc   :  { %v634_v46 = vpop.f32.mrf.mxu0  ;;  %v707_v47 = vpop.f32.mrf.mxu1 }
  0xfd   :  { %895 = vst [vmem:[#allocation6 + $0x1c] sm:$0xf] %v893_v44  ;;  %1049 = vst [vmem:[#allocation6 + $0x3c] sm:$0xf] %v1047_v45 }
  0xfe   :  { %v636_v48 = vpop.f32.mrf.mxu0  ;;  %v709_v49 = vpop.f32.mrf.mxu1 }
  0xff   :  { %1389 = shalt.err (!%p1386_p0)
}
 0x100   :  { %1085 = dma.vmem_to_hbm [thread:$0]  %s1080_s1, 1024, %s1741_s10, [#allocation5], %s1426_s3, %s1426_s3, %s1427_s18   ;;  %v536_v50 = vpop.permute.xlu1 %535  ;;  %v531_v51 = vpop.permute.xlu0 %530 }
 0x101   :  { %v638_v52 = vpop.f32.mrf.mxu0  ;;  %v711_v53 = vpop.f32.mrf.mxu1  ;;  %v635_v54 = vadd.f32 %v634_v46, %v531_v51  ;;  %v708_v55 = vadd.f32 %v707_v47, %v531_v51  ;;  %v637_v58 = vadd.f32 %v636_v48, %v531_v51  ;;  %v710_v59 = vadd.f32 %v709_v49, %v531_v51  ;;  %s1430_s10 = smov [#allocation7]  }
 0x102   :  { %v639_v56 = vadd.f32 %v638_v52, %v536_v50  ;;  %v712_v57 = vadd.f32 %v711_v53, %v536_v50  ;;  %s1091_s4 = sshll.u32 %s1430_s10, 4  ;;  %s1092_s4 = int_to_ptr.vmem [resolvable:$true] %s1091_s4 }
 0x103   :  { %v640_v60 = vpop.f32.mrf.mxu0  ;;  %v713_v61 = vpop.f32.mrf.mxu1  ;;  %s1398_s28 = scalar_lea.vmem %s1092_s4, 2048  ;;  %p1403_p2 = scmp.lt.s32.totalorder %s1092_s4, %s1092_s4 }
 0x104   :  { %v1218_v62 = vpack.c.bf16 %v639_v56, %v635_v54  ;;  %v1258_v37 = vpack.c.bf16 %v712_v57, %v708_v55  ;;  %v641_v63 = vadd.f32 %v640_v60, %v536_v50  ;;  %v714_v0 = vadd.f32 %v713_v61, %v536_v50  ;;  %v546_v7 = vpop.permute.xlu1 %545  ;;  %v541_v8 = vpop.permute.xlu0 %540  ;;  %p1399_p1 = scmp.ne.s32.totalorder %s1092_s4, %s1398_s28  ;;  %p1404_p3 = scmp.lt.s32.totalorder %s1398_s28, %s1398_s28 }
 0x105   :  { %v644_v1 = vpop.f32.mrf.mxu0  ;;  %v717_v2 = vpop.f32.mrf.mxu1 }
 0x106   :  { %1219 = vst [vmem:[#allocation7] sm:$0xff] %v1218_v62   ;;  %1259 = vst [vmem:[#allocation7 + $0x40] sm:$0xff] %v1258_v37   ;;  %v1238_v3 = vpack.c.bf16 %v641_v63, %v637_v58  ;;  %v1278_v4 = vpack.c.bf16 %v714_v0, %v710_v59  ;;  %v645_v10 = vadd.f32 %v644_v1, %v541_v8  ;;  %p1405_p4 = por %p1404_p3, %p1403_p2 }
 0x107   :  { %v646_v5 = vpop.f32.mrf.mxu0  ;;  %v719_v6 = vpop.f32.mrf.mxu1  ;;  %v718_v11 = vadd.f32 %v717_v2, %v541_v8 }
 0x108   :  { %1239 = vst [vmem:[#allocation7 + $0x20] sm:$0xff] %v1238_v3   ;;  %1279 = vst [vmem:[#allocation7 + $0x60] sm:$0xff] %v1278_v4   ;;  %v647_v14 = vadd.f32 %v646_v5, %v541_v8  ;;  %v720_v15 = vadd.f32 %v719_v6, %v541_v8  ;;  %v556_v27 = vpop.permute.xlu1 %555  ;;  %v551_v28 = vpop.permute.xlu0 %550  ;;  %p1406_p5 = pnand %p1405_p4, %p1399_p1 }
 0x109   :  { %v648_v36 = vpop.f32.mrf.mxu0  ;;  %v721_v9 = vpop.f32.mrf.mxu1 }
 0x10a   :  { %v649_v12 = vadd.f32 %v648_v36, %v546_v7  ;;  %v722_v13 = vadd.f32 %v721_v9, %v546_v7 }
 0x10b   :  { %v650_v16 = vpop.f32.mrf.mxu0  ;;  %v723_v17 = vpop.f32.mrf.mxu1 }
 0x10c   :  { %v1223_v18 = vpack.c.bf16 %v649_v12, %v645_v10  ;;  %v1263_v19 = vpack.c.bf16 %v722_v13, %v718_v11  ;;  %v651_v20 = vadd.f32 %v650_v16, %v546_v7  ;;  %v724_v21 = vadd.f32 %v723_v17, %v546_v7  ;;  %v566_v52 = vpop.permute.xlu1 %565  ;;  %v561_v53 = vpop.permute.xlu0 %560 }
 0x10d   :  { %v654_v38 = vpop.f32.mrf.mxu0  ;;  %v727_v22 = vpop.f32.mrf.mxu1 }
 0x10e   :  { %1295 = vst [vmem:[#allocation7 + $0x8] sm:$0xff] %v1223_v18   ;;  %1301 = vst [vmem:[#allocation7 + $0x48] sm:$0xff] %v1263_v19   ;;  %v1243_v23 = vpack.c.bf16 %v651_v20, %v647_v14  ;;  %v1283_v24 = vpack.c.bf16 %v724_v21, %v720_v15  ;;  %v655_v31 = vadd.f32 %v654_v38, %v551_v28 }
 0x10f   :  { %v656_v25 = vpop.f32.mrf.mxu0  ;;  %v729_v26 = vpop.f32.mrf.mxu1  ;;  %v728_v32 = vadd.f32 %v727_v22, %v551_v28 }
 0x110   :  { %1298 = vst [vmem:[#allocation7 + $0x28] sm:$0xff] %v1243_v23   ;;  %1304 = vst [vmem:[#allocation7 + $0x68] sm:$0xff] %v1283_v24   ;;  %v657_v39 = vadd.f32 %v656_v25, %v551_v28  ;;  %v730_v40 = vadd.f32 %v729_v26, %v551_v28 }
 0x111   :  { %v658_v29 = vpop.f32.mrf.mxu0  ;;  %v731_v30 = vpop.f32.mrf.mxu1 }
 0x112   :  { %v659_v33 = vadd.f32 %v658_v29, %v556_v27  ;;  %v732_v34 = vadd.f32 %v731_v30, %v556_v27 }
 0x113   :  { %v660_v41 = vpop.f32.mrf.mxu0  ;;  %v733_v42 = vpop.f32.mrf.mxu1 }
 0x114   :  { %v1228_v35 = vpack.c.bf16 %v659_v33, %v655_v31  ;;  %v1268_v43 = vpack.c.bf16 %v732_v34, %v728_v32  ;;  %v661_v44 = vadd.f32 %v660_v41, %v556_v27  ;;  %v734_v45 = vadd.f32 %v733_v42, %v556_v27 }
 0x115   :  { %v664_v46 = vpop.f32.mrf.mxu0  ;;  %v737_v47 = vpop.f32.mrf.mxu1 }
 0x116   :  { %1296 = vst [vmem:[#allocation7 + $0x10] sm:$0xff] %v1228_v35   ;;  %1302 = vst [vmem:[#allocation7 + $0x50] sm:$0xff] %v1268_v43   ;;  %v1248_v48 = vpack.c.bf16 %v661_v44, %v657_v39  ;;  %v1288_v49 = vpack.c.bf16 %v734_v45, %v730_v40  ;;  %v665_v56 = vadd.f32 %v664_v46, %v561_v53 }
 0x117   :  { %v666_v50 = vpop.f32.mrf.mxu0  ;;  %v739_v51 = vpop.f32.mrf.mxu1  ;;  %v738_v57 = vadd.f32 %v737_v47, %v561_v53 }
 0x118   :  { %1299 = vst [vmem:[#allocation7 + $0x30] sm:$0xff] %v1248_v48   ;;  %1305 = vst [vmem:[#allocation7 + $0x70] sm:$0xff] %v1288_v49   ;;  %v667_v60 = vadd.f32 %v666_v50, %v561_v53  ;;  %v740_v61 = vadd.f32 %v739_v51, %v561_v53 }
 0x119   :  { %v668_v54 = vpop.f32.mrf.mxu0  ;;  %v741_v55 = vpop.f32.mrf.mxu1 }
 0x11a   :  { %v669_v58 = vadd.f32 %v668_v54, %v566_v52  ;;  %v742_v59 = vadd.f32 %v741_v55, %v566_v52 }
 0x11b   :  { %v670_v62 = vpop.f32.mrf.mxu0  ;;  %v743_v37 = vpop.f32.mrf.mxu1 }
 0x11c   :  { %v1233_v63 = vpack.c.bf16 %v669_v58, %v665_v56  ;;  %v1273_v0 = vpack.c.bf16 %v742_v59, %v738_v57  ;;  %v671_v1 = vadd.f32 %v670_v62, %v566_v52  ;;  %v744_v2 = vadd.f32 %v743_v37, %v566_v52 }
 0x11e   :  { %1297 = vst [vmem:[#allocation7 + $0x18] sm:$0xff] %v1233_v63   ;;  %1303 = vst [vmem:[#allocation7 + $0x58] sm:$0xff] %v1273_v0   ;;  %v1253_v3 = vpack.c.bf16 %v671_v1, %v667_v60  ;;  %v1293_v4 = vpack.c.bf16 %v744_v2, %v740_v61 }
 0x120   :  { %1300 = vst [vmem:[#allocation7 + $0x38] sm:$0xff] %v1253_v3   ;;  %1306 = vst [vmem:[#allocation7 + $0x78] sm:$0xff] %v1293_v4  }
 0x121   :  { %1409 = shalt.err (!%p1406_p5)
}
 0x122   :  { %1097 = dma.vmem_to_hbm [thread:$0]  %s1092_s4, 2048, %s1742_s11, [#allocation8], %s1426_s3, %s1426_s3, %s1427_s18  }
 0x123   :  { %1418 = dma.done.wait [#allocation3], 1024  }
 0x124   :  { %1419 = vsyncadd [#allocation3], 4294966272 }
 0x125   :  { %1420 = dma.done.wait [#allocation5], 2048  }
 0x126   :  { %1421 = vsyncadd [#allocation5], 4294965248 }
 0x127   :  { %1422 = dma.done.wait [#allocation8], 2048  }
 0x128   :  { %1423 = vsyncadd [#allocation8], 4294965248 }
 0x129   :  { %1110 = vsyncpa [#allocation3], 1 }
 0x12a   :  { %1111 = vsyncpa [#allocation5], 1 }
 0x12b   :  { %1112 = vsyncpa [#allocation8], 1 }

</bundles_post_ra>
